<compile_context>
chip_gen: v6e
topology: v6e:2x2x1
jax: 0.10.0
libtpu: 0.0.40
codegen_flags: <defaults>
</compile_context>

<pallas_src>
import functools

import jax
import jax.numpy as jnp
from jax.experimental import pallas as pl
from jax.experimental.pallas import tpu as pltpu

LEAKY_SLOPE = 0.01
BN_EPS = 1e-5

# 3x3 tap offsets (dy, dx); tap index t == (dy+1)*3 + (dx+1) matches the
# (kh, kw) ordering of the per-tap weight stack built in the wrapper.
_TAPS = tuple((dy, dx) for dy in (-1, 0, 1) for dx in (-1, 0, 1))
_NONCENTER = tuple(t for t in _TAPS if t != (0, 0))  # 8 taps that need a mask


def _double_conv_kernel(masks_ref, x_ref, w1_ref, w2_ref, sh1_ref, sh2_ref,
                        o_ref, *, H, W, C_out, batch_block, compute_dtype):
    """batch_block images per grid step; activations are (C_pad, H*W) lane-dense.

    masks_ref: (8, P)                     0/1 boundary masks, resident
    x_ref    : (batch_block, C_in_pad, P)
    w1_ref   : (9, C_out_pad, C_in_pad)   per-tap conv1 weights (BN1 scale folded)
    w2_ref   : (9, C_out_pad, C_out_pad)  per-tap conv2 weights (BN2 scale folded)
    sh*_ref  : (C_out_pad, 1)             folded BN shift (f32)
    o_ref    : (batch_block, C_out, P)
    """
    P = H * W

    # Hoisted once per grid step (these blocks are resident: constant index_maps).
    masks = {}
    for i, (dy, dx) in enumerate(_NONCENTER):
        masks[(dy, dx)] = masks_ref[pl.ds(i, 1), :]            # (1, P)
    w1 = [w1_ref[t] for t in range(9)]                         # (C_out_pad, C_in_pad)
    w2 = [w2_ref[t] for t in range(9)]                         # (C_out_pad, C_out_pad)
    sh1 = sh1_ref[...]                                         # (C_out_pad, 1) f32
    sh2 = sh2_ref[...]

    def conv3x3(a, w_taps):
        """(C_src_pad, P) -> (C_dst_pad, P) f32 via 9 accumulating MXU matmuls."""
        acc = None
        for dy, dx in _TAPS:
            t = (dy + 1) * 3 + (dx + 1)
            s = dy * W + dx                                    # static flat shift
            tap = a if s == 0 else pltpu.roll(a, shift=(-s) % P, axis=1)
            if (dy, dx) != (0, 0):
                tap = tap * masks[(dy, dx)]                    # zero out-of-image taps
            contrib = jax.lax.dot_general(
                w_taps[t], tap,
                dimension_numbers=(((1,), (0,)), ((), ())),
                preferred_element_type=jnp.float32)            # (C_dst_pad, P)
            acc = contrib if acc is None else acc + contrib
        return acc

    for b in range(batch_block):                               # static unroll
        x = x_ref[b].astype(compute_dtype)                     # (C_in_pad, P)

        y = conv3x3(x, w1) + sh1                               # conv1 + BN1 shift
        y = jnp.maximum(y, LEAKY_SLOPE * y)                    # LeakyReLU (2 VPU ops)

        z = conv3x3(y.astype(compute_dtype), w2) + sh2         # conv2 + BN2 shift
        z = jnp.maximum(z, LEAKY_SLOPE * z)

        o_ref[b] = z[:C_out].astype(o_ref.dtype)               # drop padded channels


def _round_up(x, m):
    return (x + m - 1) // m * m


def double_conv_pallas(x_nchw, w1_oihw, w2_oihw,
                       g1, b1, m1, v1, g2, b2, m2, v2,
                       *, compute_dtype=jnp.float32, out_dtype=None,
                       batch_block=None, vmem_limit_bytes=32 * 1024 * 1024):
    """NCHW in / NCHW out, matching the PyTorch double_conv (eval-mode BN).

    compute_dtype   : MXU operand dtype.  f32 default (best on v5e and for small
                      channel counts); use jnp.bfloat16 on v6e/v7x for >=16
                      channels to halve HBM traffic (accumulation stays f32).
    out_dtype       : output dtype (default: x dtype); bf16 halves writeback on
                      v6e/v7x for this memory-bound kernel.
    batch_block     : images per grid step (default: auto; amortizes the
                      ~600-cycle per-step pipeline overhead).
    vmem_limit_bytes: raise above the 16/32 MiB scoped default (e.g. 64-96 MiB
                      on v6e) before scaling H*W or channel counts.
    """
    N, C_in, H, W = x_nchw.shape
    C_out = w1_oihw.shape[0]
    P = H * W
    compute_dtype = jnp.dtype(compute_dtype)
    out_dtype = jnp.dtype(out_dtype) if out_dtype is not None else x_nchw.dtype

    # Sublane tile for the compute dtype (8 rows for 4-byte, 16 for 2-byte).
    sub = (8 * 4) // compute_dtype.itemsize
    C_in_pad = _round_up(C_in, sub)
    C_out_pad = _round_up(C_out, sub)

    # ---- fold BN (eval-mode running stats) into per-channel scale/shift; fold
    # the scale into the conv weights so the kernel only adds the shift. ----
    s1 = (g1 / jnp.sqrt(v1 + BN_EPS)).astype(jnp.float32)
    s2 = (g2 / jnp.sqrt(v2 + BN_EPS)).astype(jnp.float32)
    sh1 = jnp.zeros((C_out_pad, 1), jnp.float32).at[:C_out, 0].set(b1 - m1 * s1)
    sh2 = jnp.zeros((C_out_pad, 1), jnp.float32).at[:C_out, 0].set(b2 - m2 * s2)

    # ---- per-tap weight stacks (9, C_out_pad, C_src_pad); tap t = kh*3 + kw. ----
    def tap_weights(w_oihw, scale, c_src, c_src_pad):
        c_dst = w_oihw.shape[0]
        w = jnp.transpose(w_oihw, (2, 3, 0, 1)).reshape(9, c_dst, c_src)
        w = w * scale[None, :, None]
        w = jnp.pad(w, ((0, 0), (0, C_out_pad - c_dst), (0, c_src_pad - c_src)))
        return w.astype(compute_dtype)

    w1_taps = tap_weights(w1_oihw, s1, C_in, C_in_pad)    # (9, C_out_pad, C_in_pad)
    w2_taps = tap_weights(w2_oihw, s2, C_out, C_out_pad)  # (9, C_out_pad, C_out_pad)

    # ---- 0/1 boundary masks for the 8 non-center taps, computed once. ----
    pos = jnp.arange(P, dtype=jnp.int32)
    row = pos // W
    col = pos % W
    mask_rows = []
    for dy, dx in _NONCENTER:
        valid = jnp.ones((P,), jnp.bool_)
        if dy == -1:
            valid &= row >= 1
        elif dy == 1:
            valid &= row <= H - 2
        if dx == -1:
            valid &= col >= 1
        elif dx == 1:
            valid &= col <= W - 2
        mask_rows.append(valid)
    masks = jnp.stack(mask_rows).astype(compute_dtype)          # (8, P)

    # ---- input: free reshape to (N, C_in, P); zero-pad channels only when
    # needed (one fused HBM pass); NO dtype pre-cast (cast happens in-kernel). ----
    x_flat = x_nchw.reshape(N, C_in, P)
    if C_in_pad != C_in:
        x_flat = jnp.pad(x_flat, ((0, 0), (0, C_in_pad - C_in), (0, 0)))

    # ---- batch blocking: amortize per-step pipeline overhead / DMA setup. ----
    if batch_block is None:
        io_bytes = 2 * P * (C_in_pad * x_flat.dtype.itemsize        # dbl-buffered in
                            + C_out * out_dtype.itemsize)           # dbl-buffered out
        batch_block = int(min(N, 8, max(1, (8 * 1024 * 1024) // max(io_bytes, 1))))
    batch_block = max(1, min(int(batch_block), N))
    while N % batch_block:
        batch_block -= 1
    grid = (N // batch_block,)

    kernel = functools.partial(
        _double_conv_kernel, H=H, W=W, C_out=C_out,
        batch_block=batch_block, compute_dtype=compute_dtype)

    out = pl.pallas_call(
        kernel,
        out_shape=jax.ShapeDtypeStruct((N, C_out, P), out_dtype),
        grid_spec=pltpu.PrefetchScalarGridSpec(
            num_scalar_prefetch=0,
            grid=grid,
            in_specs=[
                pl.BlockSpec((8, P), lambda n: (0, 0)),                       # masks
                pl.BlockSpec((batch_block, C_in_pad, P), lambda n: (n, 0, 0)),
                pl.BlockSpec((9, C_out_pad, C_in_pad), lambda n: (0, 0, 0)),
                pl.BlockSpec((9, C_out_pad, C_out_pad), lambda n: (0, 0, 0)),
                pl.BlockSpec((C_out_pad, 1), lambda n: (0, 0)),
                pl.BlockSpec((C_out_pad, 1), lambda n: (0, 0)),
            ],
            out_specs=pl.BlockSpec((batch_block, C_out, P), lambda n: (n, 0, 0)),
        ),
        compiler_params=pltpu.CompilerParams(
            dimension_semantics=("parallel",),
            vmem_limit_bytes=vmem_limit_bytes),
    )(masks, x_flat, w1_taps, w2_taps, sh1, sh2)

    return out.reshape(N, C_out, H, W)   # already NCHW: reshape only


def _reference_forward(x, w1, w2, g1, b1, m1, v1, g2, b2, m2, v2):
    """Pure-JAX reference in NCHW, mirroring the PyTorch forward (eval BN)."""
    def bn(y, g, b, m, v):
        return (y - m[None, :, None, None]) / jnp.sqrt(v + BN_EPS)[None, :, None, None] \
               * g[None, :, None, None] + b[None, :, None, None]

    def lrelu(y):
        return jnp.where(y >= 0, y, LEAKY_SLOPE * y)

    dn = ('NCHW', 'OIHW', 'NCHW')
    y = jax.lax.conv_general_dilated(x, w1, (1, 1), 'SAME', dimension_numbers=dn)
    y = lrelu(bn(y, g1, b1, m1, v1))
    y = jax.lax.conv_general_dilated(y, w2, (1, 1), 'SAME', dimension_numbers=dn)
    y = lrelu(bn(y, g2, b2, m2, v2))
    return y


if __name__ == "__main__":
    key = jax.random.PRNGKey(0)
    keys = jax.random.split(key, 8)

    N, C_in, C_out, H, W = 2, 4, 8, 16, 16

    x = jax.random.normal(keys[0], (N, C_in, H, W), jnp.float32)
    w1 = jax.random.normal(keys[1], (C_out, C_in, 3, 3), jnp.float32) * 0.2
    w2 = jax.random.normal(keys[2], (C_out, C_out, 3, 3), jnp.float32) * 0.2

    # deterministic BatchNorm parameters / running statistics
    g1 = jnp.linspace(0.5, 1.5, C_out, dtype=jnp.float32)
    b1 = jnp.linspace(-0.2, 0.2, C_out, dtype=jnp.float32)
    m1 = 0.1 * jax.random.normal(keys[3], (C_out,), jnp.float32)
    v1 = 1.0 + 0.1 * jax.random.uniform(keys[4], (C_out,), jnp.float32)
    g2 = jnp.linspace(1.2, 0.8, C_out, dtype=jnp.float32)
    b2 = jnp.linspace(0.1, -0.1, C_out, dtype=jnp.float32)
    m2 = 0.1 * jax.random.normal(keys[5], (C_out,), jnp.float32)
    v2 = 1.0 + 0.1 * jax.random.uniform(keys[6], (C_out,), jnp.float32)

    out = double_conv_pallas(x, w1, w2, g1, b1, m1, v1, g2, b2, m2, v2)
    out = jax.block_until_ready(out)

    ref = _reference_forward(x, w1, w2, g1, b1, m1, v1, g2, b2, m2, v2)
    ref = jax.block_until_ready(ref)

    assert out.shape == (N, C_out, H, W), out.shape
    max_err = jnp.max(jnp.abs(out - ref))
    assert jnp.allclose(out, ref, rtol=1e-3, atol=1e-3), f"max abs err {max_err}"

    print("KERNEL_OK")
</pallas_src>

<mosaic_0001>
module attributes {stable_mosaic.version = 11 : i64} {
  func.func @_double_conv_kernel(%arg0: i32, %arg1: memref<8x256xf32, #tpu.memory_space<vmem>>, %arg2: memref<2x8x256xf32, #tpu.memory_space<vmem>>, %arg3: memref<9x8x8xf32, #tpu.memory_space<vmem>>, %arg4: memref<9x8x8xf32, #tpu.memory_space<vmem>>, %arg5: memref<8x1xf32, #tpu.memory_space<vmem>>, %arg6: memref<8x1xf32, #tpu.memory_space<vmem>>, %arg7: memref<2x8x256xf32, #tpu.memory_space<vmem>>) attributes {dimension_semantics = [#tpu.dimension_semantics<parallel>], iteration_bounds = array<i64: 1>, scalar_prefetch = 0 : i64, scratch_operands = 0 : i64, tpu.core_type = #tpu.core_type<tc>, window_params = [{pipeline_mode = #tpu.pipeline_mode<synchronous>, transform_indices = @transform_0, window_bounds = array<i64: 8, 256>}, {transform_indices = @transform_1, window_bounds = array<i64: 2, 8, 256>}, {pipeline_mode = #tpu.pipeline_mode<synchronous>, transform_indices = @transform_2, window_bounds = array<i64: 9, 8, 8>}, {pipeline_mode = #tpu.pipeline_mode<synchronous>, transform_indices = @transform_3, window_bounds = array<i64: 9, 8, 8>}, {pipeline_mode = #tpu.pipeline_mode<synchronous>, transform_indices = @transform_4, window_bounds = array<i64: 8, 1>}, {pipeline_mode = #tpu.pipeline_mode<synchronous>, transform_indices = @transform_5, window_bounds = array<i64: 8, 1>}, {transform_indices = @transform_6, window_bounds = array<i64: 2, 8, 256>}]} {
    %c0 = arith.constant 0 : index
    %c0_0 = arith.constant 0 : index
    %0 = vector.load %arg1[%c0, %c0_0] : memref<8x256xf32, #tpu.memory_space<vmem>>, vector<1x256xf32>
    %c1 = arith.constant 1 : index
    %c0_1 = arith.constant 0 : index
    %1 = vector.load %arg1[%c1, %c0_1] : memref<8x256xf32, #tpu.memory_space<vmem>>, vector<1x256xf32>
    %c2 = arith.constant 2 : index
    %c0_2 = arith.constant 0 : index
    %2 = vector.load %arg1[%c2, %c0_2] : memref<8x256xf32, #tpu.memory_space<vmem>>, vector<1x256xf32>
    %c3 = arith.constant 3 : index
    %c0_3 = arith.constant 0 : index
    %3 = vector.load %arg1[%c3, %c0_3] : memref<8x256xf32, #tpu.memory_space<vmem>>, vector<1x256xf32>
    %c4 = arith.constant 4 : index
    %c0_4 = arith.constant 0 : index
    %4 = vector.load %arg1[%c4, %c0_4] : memref<8x256xf32, #tpu.memory_space<vmem>>, vector<1x256xf32>
    %c5 = arith.constant 5 : index
    %c0_5 = arith.constant 0 : index
    %5 = vector.load %arg1[%c5, %c0_5] : memref<8x256xf32, #tpu.memory_space<vmem>>, vector<1x256xf32>
    %c6 = arith.constant 6 : index
    %c0_6 = arith.constant 0 : index
    %6 = vector.load %arg1[%c6, %c0_6] : memref<8x256xf32, #tpu.memory_space<vmem>>, vector<1x256xf32>
    %c7 = arith.constant 7 : index
    %c0_7 = arith.constant 0 : index
    %7 = vector.load %arg1[%c7, %c0_7] : memref<8x256xf32, #tpu.memory_space<vmem>>, vector<1x256xf32>
    %c0_8 = arith.constant 0 : index
    %c0_9 = arith.constant 0 : index
    %c0_10 = arith.constant 0 : index
    %8 = vector.load %arg3[%c0_8, %c0_9, %c0_10] : memref<9x8x8xf32, #tpu.memory_space<vmem>>, vector<1x8x8xf32>
    %9 = vector.shape_cast %8 : vector<1x8x8xf32> to vector<8x8xf32>
    %c1_11 = arith.constant 1 : index
    %c0_12 = arith.constant 0 : index
    %c0_13 = arith.constant 0 : index
    %10 = vector.load %arg3[%c1_11, %c0_12, %c0_13] : memref<9x8x8xf32, #tpu.memory_space<vmem>>, vector<1x8x8xf32>
    %11 = vector.shape_cast %10 : vector<1x8x8xf32> to vector<8x8xf32>
    %c2_14 = arith.constant 2 : index
    %c0_15 = arith.constant 0 : index
    %c0_16 = arith.constant 0 : index
    %12 = vector.load %arg3[%c2_14, %c0_15, %c0_16] : memref<9x8x8xf32, #tpu.memory_space<vmem>>, vector<1x8x8xf32>
    %13 = vector.shape_cast %12 : vector<1x8x8xf32> to vector<8x8xf32>
    %c3_17 = arith.constant 3 : index
    %c0_18 = arith.constant 0 : index
    %c0_19 = arith.constant 0 : index
    %14 = vector.load %arg3[%c3_17, %c0_18, %c0_19] : memref<9x8x8xf32, #tpu.memory_space<vmem>>, vector<1x8x8xf32>
    %15 = vector.shape_cast %14 : vector<1x8x8xf32> to vector<8x8xf32>
    %c4_20 = arith.constant 4 : index
    %c0_21 = arith.constant 0 : index
    %c0_22 = arith.constant 0 : index
    %16 = vector.load %arg3[%c4_20, %c0_21, %c0_22] : memref<9x8x8xf32, #tpu.memory_space<vmem>>, vector<1x8x8xf32>
    %17 = vector.shape_cast %16 : vector<1x8x8xf32> to vector<8x8xf32>
    %c5_23 = arith.constant 5 : index
    %c0_24 = arith.constant 0 : index
    %c0_25 = arith.constant 0 : index
    %18 = vector.load %arg3[%c5_23, %c0_24, %c0_25] : memref<9x8x8xf32, #tpu.memory_space<vmem>>, vector<1x8x8xf32>
    %19 = vector.shape_cast %18 : vector<1x8x8xf32> to vector<8x8xf32>
    %c6_26 = arith.constant 6 : index
    %c0_27 = arith.constant 0 : index
    %c0_28 = arith.constant 0 : index
    %20 = vector.load %arg3[%c6_26, %c0_27, %c0_28] : memref<9x8x8xf32, #tpu.memory_space<vmem>>, vector<1x8x8xf32>
    %21 = vector.shape_cast %20 : vector<1x8x8xf32> to vector<8x8xf32>
    %c7_29 = arith.constant 7 : index
    %c0_30 = arith.constant 0 : index
    %c0_31 = arith.constant 0 : index
    %22 = vector.load %arg3[%c7_29, %c0_30, %c0_31] : memref<9x8x8xf32, #tpu.memory_space<vmem>>, vector<1x8x8xf32>
    %23 = vector.shape_cast %22 : vector<1x8x8xf32> to vector<8x8xf32>
    %c8 = arith.constant 8 : index
    %c0_32 = arith.constant 0 : index
    %c0_33 = arith.constant 0 : index
    %24 = vector.load %arg3[%c8, %c0_32, %c0_33] : memref<9x8x8xf32, #tpu.memory_space<vmem>>, vector<1x8x8xf32>
    %25 = vector.shape_cast %24 : vector<1x8x8xf32> to vector<8x8xf32>
    %c0_34 = arith.constant 0 : index
    %c0_35 = arith.constant 0 : index
    %c0_36 = arith.constant 0 : index
    %26 = vector.load %arg4[%c0_34, %c0_35, %c0_36] : memref<9x8x8xf32, #tpu.memory_space<vmem>>, vector<1x8x8xf32>
    %27 = vector.shape_cast %26 : vector<1x8x8xf32> to vector<8x8xf32>
    %c1_37 = arith.constant 1 : index
    %c0_38 = arith.constant 0 : index
    %c0_39 = arith.constant 0 : index
    %28 = vector.load %arg4[%c1_37, %c0_38, %c0_39] : memref<9x8x8xf32, #tpu.memory_space<vmem>>, vector<1x8x8xf32>
    %29 = vector.shape_cast %28 : vector<1x8x8xf32> to vector<8x8xf32>
    %c2_40 = arith.constant 2 : index
    %c0_41 = arith.constant 0 : index
    %c0_42 = arith.constant 0 : index
    %30 = vector.load %arg4[%c2_40, %c0_41, %c0_42] : memref<9x8x8xf32, #tpu.memory_space<vmem>>, vector<1x8x8xf32>
    %31 = vector.shape_cast %30 : vector<1x8x8xf32> to vector<8x8xf32>
    %c3_43 = arith.constant 3 : index
    %c0_44 = arith.constant 0 : index
    %c0_45 = arith.constant 0 : index
    %32 = vector.load %arg4[%c3_43, %c0_44, %c0_45] : memref<9x8x8xf32, #tpu.memory_space<vmem>>, vector<1x8x8xf32>
    %33 = vector.shape_cast %32 : vector<1x8x8xf32> to vector<8x8xf32>
    %c4_46 = arith.constant 4 : index
    %c0_47 = arith.constant 0 : index
    %c0_48 = arith.constant 0 : index
    %34 = vector.load %arg4[%c4_46, %c0_47, %c0_48] : memref<9x8x8xf32, #tpu.memory_space<vmem>>, vector<1x8x8xf32>
    %35 = vector.shape_cast %34 : vector<1x8x8xf32> to vector<8x8xf32>
    %c5_49 = arith.constant 5 : index
    %c0_50 = arith.constant 0 : index
    %c0_51 = arith.constant 0 : index
    %36 = vector.load %arg4[%c5_49, %c0_50, %c0_51] : memref<9x8x8xf32, #tpu.memory_space<vmem>>, vector<1x8x8xf32>
    %37 = vector.shape_cast %36 : vector<1x8x8xf32> to vector<8x8xf32>
    %c6_52 = arith.constant 6 : index
    %c0_53 = arith.constant 0 : index
    %c0_54 = arith.constant 0 : index
    %38 = vector.load %arg4[%c6_52, %c0_53, %c0_54] : memref<9x8x8xf32, #tpu.memory_space<vmem>>, vector<1x8x8xf32>
    %39 = vector.shape_cast %38 : vector<1x8x8xf32> to vector<8x8xf32>
    %c7_55 = arith.constant 7 : index
    %c0_56 = arith.constant 0 : index
    %c0_57 = arith.constant 0 : index
    %40 = vector.load %arg4[%c7_55, %c0_56, %c0_57] : memref<9x8x8xf32, #tpu.memory_space<vmem>>, vector<1x8x8xf32>
    %41 = vector.shape_cast %40 : vector<1x8x8xf32> to vector<8x8xf32>
    %c8_58 = arith.constant 8 : index
    %c0_59 = arith.constant 0 : index
    %c0_60 = arith.constant 0 : index
    %42 = vector.load %arg4[%c8_58, %c0_59, %c0_60] : memref<9x8x8xf32, #tpu.memory_space<vmem>>, vector<1x8x8xf32>
    %43 = vector.shape_cast %42 : vector<1x8x8xf32> to vector<8x8xf32>
    %c0_61 = arith.constant 0 : index
    %c0_62 = arith.constant 0 : index
    %44 = vector.load %arg5[%c0_61, %c0_62] : memref<8x1xf32, #tpu.memory_space<vmem>>, vector<8x1xf32>
    %c0_63 = arith.constant 0 : index
    %c0_64 = arith.constant 0 : index
    %45 = vector.load %arg6[%c0_63, %c0_64] : memref<8x1xf32, #tpu.memory_space<vmem>>, vector<8x1xf32>
    %c0_65 = arith.constant 0 : index
    %c0_66 = arith.constant 0 : index
    %c0_67 = arith.constant 0 : index
    %46 = vector.load %arg2[%c0_65, %c0_66, %c0_67] : memref<2x8x256xf32, #tpu.memory_space<vmem>>, vector<1x8x256xf32>
    %47 = vector.shape_cast %46 : vector<1x8x256xf32> to vector<8x256xf32>
    %c17_i32 = arith.constant 17 : i32
    %48 = tpu.dynamic_rotate %47 by %c17_i32 dim 1 : vector<8x256xf32>, i32 -> vector<8x256xf32>
    %49 = vector.broadcast %0 : vector<1x256xf32> to vector<8x256xf32>
    %50 = arith.mulf %48, %49 : vector<8x256xf32>
    %cst = arith.constant dense<0.000000e+00> : vector<8x256xf32>
    %51 = tpu.matmul %9, %50, %cst {dimension_numbers = #tpu.dot_dimension_numbers<[1], [0], [0], [1], [0, 0, 1, 1], [], []>} : vector<8x8xf32>, vector<8x256xf32>, vector<8x256xf32> -> vector<8x256xf32>
    %c16_i32 = arith.constant 16 : i32
    %52 = tpu.dynamic_rotate %47 by %c16_i32 dim 1 : vector<8x256xf32>, i32 -> vector<8x256xf32>
    %53 = vector.broadcast %1 : vector<1x256xf32> to vector<8x256xf32>
    %54 = arith.mulf %52, %53 : vector<8x256xf32>
    %cst_68 = arith.constant dense<0.000000e+00> : vector<8x256xf32>
    %55 = tpu.matmul %11, %54, %cst_68 {dimension_numbers = #tpu.dot_dimension_numbers<[1], [0], [0], [1], [0, 0, 1, 1], [], []>} : vector<8x8xf32>, vector<8x256xf32>, vector<8x256xf32> -> vector<8x256xf32>
    %56 = arith.addf %51, %55 : vector<8x256xf32>
    %c15_i32 = arith.constant 15 : i32
    %57 = tpu.dynamic_rotate %47 by %c15_i32 dim 1 : vector<8x256xf32>, i32 -> vector<8x256xf32>
    %58 = vector.broadcast %2 : vector<1x256xf32> to vector<8x256xf32>
    %59 = arith.mulf %57, %58 : vector<8x256xf32>
    %cst_69 = arith.constant dense<0.000000e+00> : vector<8x256xf32>
    %60 = tpu.matmul %13, %59, %cst_69 {dimension_numbers = #tpu.dot_dimension_numbers<[1], [0], [0], [1], [0, 0, 1, 1], [], []>} : vector<8x8xf32>, vector<8x256xf32>, vector<8x256xf32> -> vector<8x256xf32>
    %61 = arith.addf %56, %60 : vector<8x256xf32>
    %c1_i32 = arith.constant 1 : i32
    %62 = tpu.dynamic_rotate %47 by %c1_i32 dim 1 : vector<8x256xf32>, i32 -> vector<8x256xf32>
    %63 = vector.broadcast %3 : vector<1x256xf32> to vector<8x256xf32>
    %64 = arith.mulf %62, %63 : vector<8x256xf32>
    %cst_70 = arith.constant dense<0.000000e+00> : vector<8x256xf32>
    %65 = tpu.matmul %15, %64, %cst_70 {dimension_numbers = #tpu.dot_dimension_numbers<[1], [0], [0], [1], [0, 0, 1, 1], [], []>} : vector<8x8xf32>, vector<8x256xf32>, vector<8x256xf32> -> vector<8x256xf32>
    %66 = arith.addf %61, %65 : vector<8x256xf32>
    %cst_71 = arith.constant dense<0.000000e+00> : vector<8x256xf32>
    %67 = tpu.matmul %17, %47, %cst_71 {dimension_numbers = #tpu.dot_dimension_numbers<[1], [0], [0], [1], [0, 0, 1, 1], [], []>} : vector<8x8xf32>, vector<8x256xf32>, vector<8x256xf32> -> vector<8x256xf32>
    %68 = arith.addf %66, %67 : vector<8x256xf32>
    %c255_i32 = arith.constant 255 : i32
    %69 = tpu.dynamic_rotate %47 by %c255_i32 dim 1 : vector<8x256xf32>, i32 -> vector<8x256xf32>
    %70 = vector.broadcast %4 : vector<1x256xf32> to vector<8x256xf32>
    %71 = arith.mulf %69, %70 : vector<8x256xf32>
    %cst_72 = arith.constant dense<0.000000e+00> : vector<8x256xf32>
    %72 = tpu.matmul %19, %71, %cst_72 {dimension_numbers = #tpu.dot_dimension_numbers<[1], [0], [0], [1], [0, 0, 1, 1], [], []>} : vector<8x8xf32>, vector<8x256xf32>, vector<8x256xf32> -> vector<8x256xf32>
    %73 = arith.addf %68, %72 : vector<8x256xf32>
    %c241_i32 = arith.constant 241 : i32
    %74 = tpu.dynamic_rotate %47 by %c241_i32 dim 1 : vector<8x256xf32>, i32 -> vector<8x256xf32>
    %75 = vector.broadcast %5 : vector<1x256xf32> to vector<8x256xf32>
    %76 = arith.mulf %74, %75 : vector<8x256xf32>
    %cst_73 = arith.constant dense<0.000000e+00> : vector<8x256xf32>
    %77 = tpu.matmul %21, %76, %cst_73 {dimension_numbers = #tpu.dot_dimension_numbers<[1], [0], [0], [1], [0, 0, 1, 1], [], []>} : vector<8x8xf32>, vector<8x256xf32>, vector<8x256xf32> -> vector<8x256xf32>
    %78 = arith.addf %73, %77 : vector<8x256xf32>
    %c240_i32 = arith.constant 240 : i32
    %79 = tpu.dynamic_rotate %47 by %c240_i32 dim 1 : vector<8x256xf32>, i32 -> vector<8x256xf32>
    %80 = vector.broadcast %6 : vector<1x256xf32> to vector<8x256xf32>
    %81 = arith.mulf %79, %80 : vector<8x256xf32>
    %cst_74 = arith.constant dense<0.000000e+00> : vector<8x256xf32>
    %82 = tpu.matmul %23, %81, %cst_74 {dimension_numbers = #tpu.dot_dimension_numbers<[1], [0], [0], [1], [0, 0, 1, 1], [], []>} : vector<8x8xf32>, vector<8x256xf32>, vector<8x256xf32> -> vector<8x256xf32>
    %83 = arith.addf %78, %82 : vector<8x256xf32>
    %c239_i32 = arith.constant 239 : i32
    %84 = tpu.dynamic_rotate %47 by %c239_i32 dim 1 : vector<8x256xf32>, i32 -> vector<8x256xf32>
    %85 = vector.broadcast %7 : vector<1x256xf32> to vector<8x256xf32>
    %86 = arith.mulf %84, %85 : vector<8x256xf32>
    %cst_75 = arith.constant dense<0.000000e+00> : vector<8x256xf32>
    %87 = tpu.matmul %25, %86, %cst_75 {dimension_numbers = #tpu.dot_dimension_numbers<[1], [0], [0], [1], [0, 0, 1, 1], [], []>} : vector<8x8xf32>, vector<8x256xf32>, vector<8x256xf32> -> vector<8x256xf32>
    %88 = arith.addf %83, %87 : vector<8x256xf32>
    %89 = vector.broadcast %44 : vector<8x1xf32> to vector<8x256xf32>
    %90 = arith.addf %88, %89 : vector<8x256xf32>
    %cst_76 = arith.constant 0.00999999977 : f32
    %91 = vector.broadcast %cst_76 : f32 to vector<8x256xf32>
    %92 = arith.mulf %91, %90 : vector<8x256xf32>
    %93 = arith.maximumf %90, %92 : vector<8x256xf32>
    %c17_i32_77 = arith.constant 17 : i32
    %94 = tpu.dynamic_rotate %93 by %c17_i32_77 dim 1 : vector<8x256xf32>, i32 -> vector<8x256xf32>
    %95 = vector.broadcast %0 : vector<1x256xf32> to vector<8x256xf32>
    %96 = arith.mulf %94, %95 : vector<8x256xf32>
    %cst_78 = arith.constant dense<0.000000e+00> : vector<8x256xf32>
    %97 = tpu.matmul %27, %96, %cst_78 {dimension_numbers = #tpu.dot_dimension_numbers<[1], [0], [0], [1], [0, 0, 1, 1], [], []>} : vector<8x8xf32>, vector<8x256xf32>, vector<8x256xf32> -> vector<8x256xf32>
    %c16_i32_79 = arith.constant 16 : i32
    %98 = tpu.dynamic_rotate %93 by %c16_i32_79 dim 1 : vector<8x256xf32>, i32 -> vector<8x256xf32>
    %99 = vector.broadcast %1 : vector<1x256xf32> to vector<8x256xf32>
    %100 = arith.mulf %98, %99 : vector<8x256xf32>
    %cst_80 = arith.constant dense<0.000000e+00> : vector<8x256xf32>
    %101 = tpu.matmul %29, %100, %cst_80 {dimension_numbers = #tpu.dot_dimension_numbers<[1], [0], [0], [1], [0, 0, 1, 1], [], []>} : vector<8x8xf32>, vector<8x256xf32>, vector<8x256xf32> -> vector<8x256xf32>
    %102 = arith.addf %97, %101 : vector<8x256xf32>
    %c15_i32_81 = arith.constant 15 : i32
    %103 = tpu.dynamic_rotate %93 by %c15_i32_81 dim 1 : vector<8x256xf32>, i32 -> vector<8x256xf32>
    %104 = vector.broadcast %2 : vector<1x256xf32> to vector<8x256xf32>
    %105 = arith.mulf %103, %104 : vector<8x256xf32>
    %cst_82 = arith.constant dense<0.000000e+00> : vector<8x256xf32>
    %106 = tpu.matmul %31, %105, %cst_82 {dimension_numbers = #tpu.dot_dimension_numbers<[1], [0], [0], [1], [0, 0, 1, 1], [], []>} : vector<8x8xf32>, vector<8x256xf32>, vector<8x256xf32> -> vector<8x256xf32>
    %107 = arith.addf %102, %106 : vector<8x256xf32>
    %c1_i32_83 = arith.constant 1 : i32
    %108 = tpu.dynamic_rotate %93 by %c1_i32_83 dim 1 : vector<8x256xf32>, i32 -> vector<8x256xf32>
    %109 = vector.broadcast %3 : vector<1x256xf32> to vector<8x256xf32>
    %110 = arith.mulf %108, %109 : vector<8x256xf32>
    %cst_84 = arith.constant dense<0.000000e+00> : vector<8x256xf32>
    %111 = tpu.matmul %33, %110, %cst_84 {dimension_numbers = #tpu.dot_dimension_numbers<[1], [0], [0], [1], [0, 0, 1, 1], [], []>} : vector<8x8xf32>, vector<8x256xf32>, vector<8x256xf32> -> vector<8x256xf32>
    %112 = arith.addf %107, %111 : vector<8x256xf32>
    %cst_85 = arith.constant dense<0.000000e+00> : vector<8x256xf32>
    %113 = tpu.matmul %35, %93, %cst_85 {dimension_numbers = #tpu.dot_dimension_numbers<[1], [0], [0], [1], [0, 0, 1, 1], [], []>} : vector<8x8xf32>, vector<8x256xf32>, vector<8x256xf32> -> vector<8x256xf32>
    %114 = arith.addf %112, %113 : vector<8x256xf32>
    %c255_i32_86 = arith.constant 255 : i32
    %115 = tpu.dynamic_rotate %93 by %c255_i32_86 dim 1 : vector<8x256xf32>, i32 -> vector<8x256xf32>
    %116 = vector.broadcast %4 : vector<1x256xf32> to vector<8x256xf32>
    %117 = arith.mulf %115, %116 : vector<8x256xf32>
    %cst_87 = arith.constant dense<0.000000e+00> : vector<8x256xf32>
    %118 = tpu.matmul %37, %117, %cst_87 {dimension_numbers = #tpu.dot_dimension_numbers<[1], [0], [0], [1], [0, 0, 1, 1], [], []>} : vector<8x8xf32>, vector<8x256xf32>, vector<8x256xf32> -> vector<8x256xf32>
    %119 = arith.addf %114, %118 : vector<8x256xf32>
    %c241_i32_88 = arith.constant 241 : i32
    %120 = tpu.dynamic_rotate %93 by %c241_i32_88 dim 1 : vector<8x256xf32>, i32 -> vector<8x256xf32>
    %121 = vector.broadcast %5 : vector<1x256xf32> to vector<8x256xf32>
    %122 = arith.mulf %120, %121 : vector<8x256xf32>
    %cst_89 = arith.constant dense<0.000000e+00> : vector<8x256xf32>
    %123 = tpu.matmul %39, %122, %cst_89 {dimension_numbers = #tpu.dot_dimension_numbers<[1], [0], [0], [1], [0, 0, 1, 1], [], []>} : vector<8x8xf32>, vector<8x256xf32>, vector<8x256xf32> -> vector<8x256xf32>
    %124 = arith.addf %119, %123 : vector<8x256xf32>
    %c240_i32_90 = arith.constant 240 : i32
    %125 = tpu.dynamic_rotate %93 by %c240_i32_90 dim 1 : vector<8x256xf32>, i32 -> vector<8x256xf32>
    %126 = vector.broadcast %6 : vector<1x256xf32> to vector<8x256xf32>
    %127 = arith.mulf %125, %126 : vector<8x256xf32>
    %cst_91 = arith.constant dense<0.000000e+00> : vector<8x256xf32>
    %128 = tpu.matmul %41, %127, %cst_91 {dimension_numbers = #tpu.dot_dimension_numbers<[1], [0], [0], [1], [0, 0, 1, 1], [], []>} : vector<8x8xf32>, vector<8x256xf32>, vector<8x256xf32> -> vector<8x256xf32>
    %129 = arith.addf %124, %128 : vector<8x256xf32>
    %c239_i32_92 = arith.constant 239 : i32
    %130 = tpu.dynamic_rotate %93 by %c239_i32_92 dim 1 : vector<8x256xf32>, i32 -> vector<8x256xf32>
    %131 = vector.broadcast %7 : vector<1x256xf32> to vector<8x256xf32>
    %132 = arith.mulf %130, %131 : vector<8x256xf32>
    %cst_93 = arith.constant dense<0.000000e+00> : vector<8x256xf32>
    %133 = tpu.matmul %43, %132, %cst_93 {dimension_numbers = #tpu.dot_dimension_numbers<[1], [0], [0], [1], [0, 0, 1, 1], [], []>} : vector<8x8xf32>, vector<8x256xf32>, vector<8x256xf32> -> vector<8x256xf32>
    %134 = arith.addf %129, %133 : vector<8x256xf32>
    %135 = vector.broadcast %45 : vector<8x1xf32> to vector<8x256xf32>
    %136 = arith.addf %134, %135 : vector<8x256xf32>
    %cst_94 = arith.constant 0.00999999977 : f32
    %137 = vector.broadcast %cst_94 : f32 to vector<8x256xf32>
    %138 = arith.mulf %137, %136 : vector<8x256xf32>
    %139 = arith.maximumf %136, %138 : vector<8x256xf32>
    %c0_95 = arith.constant 0 : index
    %c0_96 = arith.constant 0 : index
    %c0_97 = arith.constant 0 : index
    %140 = vector.load %arg7[%c0_95, %c0_96, %c0_97] : memref<2x8x256xf32, #tpu.memory_space<vmem>>, vector<1x8x256xf32>
    %141 = vector.shape_cast %140 : vector<1x8x256xf32> to vector<8x256xf32>
    %142 = vector.shape_cast %139 : vector<8x256xf32> to vector<1x8x256xf32>
    tpu.vector_store %arg7[%c0_95, %c0_96, %c0_97], %142 {strides = array<i32>} : memref<2x8x256xf32, #tpu.memory_space<vmem>>, vector<1x8x256xf32>,
    %c1_98 = arith.constant 1 : index
    %c0_99 = arith.constant 0 : index
    %c0_100 = arith.constant 0 : index
    %143 = vector.load %arg2[%c1_98, %c0_99, %c0_100] : memref<2x8x256xf32, #tpu.memory_space<vmem>>, vector<1x8x256xf32>
    %144 = vector.shape_cast %143 : vector<1x8x256xf32> to vector<8x256xf32>
    %c17_i32_101 = arith.constant 17 : i32
    %145 = tpu.dynamic_rotate %144 by %c17_i32_101 dim 1 : vector<8x256xf32>, i32 -> vector<8x256xf32>
    %146 = vector.broadcast %0 : vector<1x256xf32> to vector<8x256xf32>
    %147 = arith.mulf %145, %146 : vector<8x256xf32>
    %cst_102 = arith.constant dense<0.000000e+00> : vector<8x256xf32>
    %148 = tpu.matmul %9, %147, %cst_102 {dimension_numbers = #tpu.dot_dimension_numbers<[1], [0], [0], [1], [0, 0, 1, 1], [], []>} : vector<8x8xf32>, vector<8x256xf32>, vector<8x256xf32> -> vector<8x256xf32>
    %c16_i32_103 = arith.constant 16 : i32
    %149 = tpu.dynamic_rotate %144 by %c16_i32_103 dim 1 : vector<8x256xf32>, i32 -> vector<8x256xf32>
    %150 = vector.broadcast %1 : vector<1x256xf32> to vector<8x256xf32>
    %151 = arith.mulf %149, %150 : vector<8x256xf32>
    %cst_104 = arith.constant dense<0.000000e+00> : vector<8x256xf32>
    %152 = tpu.matmul %11, %151, %cst_104 {dimension_numbers = #tpu.dot_dimension_numbers<[1], [0], [0], [1], [0, 0, 1, 1], [], []>} : vector<8x8xf32>, vector<8x256xf32>, vector<8x256xf32> -> vector<8x256xf32>
    %153 = arith.addf %148, %152 : vector<8x256xf32>
    %c15_i32_105 = arith.constant 15 : i32
    %154 = tpu.dynamic_rotate %144 by %c15_i32_105 dim 1 : vector<8x256xf32>, i32 -> vector<8x256xf32>
    %155 = vector.broadcast %2 : vector<1x256xf32> to vector<8x256xf32>
    %156 = arith.mulf %154, %155 : vector<8x256xf32>
    %cst_106 = arith.constant dense<0.000000e+00> : vector<8x256xf32>
    %157 = tpu.matmul %13, %156, %cst_106 {dimension_numbers = #tpu.dot_dimension_numbers<[1], [0], [0], [1], [0, 0, 1, 1], [], []>} : vector<8x8xf32>, vector<8x256xf32>, vector<8x256xf32> -> vector<8x256xf32>
    %158 = arith.addf %153, %157 : vector<8x256xf32>
    %c1_i32_107 = arith.constant 1 : i32
    %159 = tpu.dynamic_rotate %144 by %c1_i32_107 dim 1 : vector<8x256xf32>, i32 -> vector<8x256xf32>
    %160 = vector.broadcast %3 : vector<1x256xf32> to vector<8x256xf32>
    %161 = arith.mulf %159, %160 : vector<8x256xf32>
    %cst_108 = arith.constant dense<0.000000e+00> : vector<8x256xf32>
    %162 = tpu.matmul %15, %161, %cst_108 {dimension_numbers = #tpu.dot_dimension_numbers<[1], [0], [0], [1], [0, 0, 1, 1], [], []>} : vector<8x8xf32>, vector<8x256xf32>, vector<8x256xf32> -> vector<8x256xf32>
    %163 = arith.addf %158, %162 : vector<8x256xf32>
    %cst_109 = arith.constant dense<0.000000e+00> : vector<8x256xf32>
    %164 = tpu.matmul %17, %144, %cst_109 {dimension_numbers = #tpu.dot_dimension_numbers<[1], [0], [0], [1], [0, 0, 1, 1], [], []>} : vector<8x8xf32>, vector<8x256xf32>, vector<8x256xf32> -> vector<8x256xf32>
    %165 = arith.addf %163, %164 : vector<8x256xf32>
    %c255_i32_110 = arith.constant 255 : i32
    %166 = tpu.dynamic_rotate %144 by %c255_i32_110 dim 1 : vector<8x256xf32>, i32 -> vector<8x256xf32>
    %167 = vector.broadcast %4 : vector<1x256xf32> to vector<8x256xf32>
    %168 = arith.mulf %166, %167 : vector<8x256xf32>
    %cst_111 = arith.constant dense<0.000000e+00> : vector<8x256xf32>
    %169 = tpu.matmul %19, %168, %cst_111 {dimension_numbers = #tpu.dot_dimension_numbers<[1], [0], [0], [1], [0, 0, 1, 1], [], []>} : vector<8x8xf32>, vector<8x256xf32>, vector<8x256xf32> -> vector<8x256xf32>
    %170 = arith.addf %165, %169 : vector<8x256xf32>
    %c241_i32_112 = arith.constant 241 : i32
    %171 = tpu.dynamic_rotate %144 by %c241_i32_112 dim 1 : vector<8x256xf32>, i32 -> vector<8x256xf32>
    %172 = vector.broadcast %5 : vector<1x256xf32> to vector<8x256xf32>
    %173 = arith.mulf %171, %172 : vector<8x256xf32>
    %cst_113 = arith.constant dense<0.000000e+00> : vector<8x256xf32>
    %174 = tpu.matmul %21, %173, %cst_113 {dimension_numbers = #tpu.dot_dimension_numbers<[1], [0], [0], [1], [0, 0, 1, 1], [], []>} : vector<8x8xf32>, vector<8x256xf32>, vector<8x256xf32> -> vector<8x256xf32>
    %175 = arith.addf %170, %174 : vector<8x256xf32>
    %c240_i32_114 = arith.constant 240 : i32
    %176 = tpu.dynamic_rotate %144 by %c240_i32_114 dim 1 : vector<8x256xf32>, i32 -> vector<8x256xf32>
    %177 = vector.broadcast %6 : vector<1x256xf32> to vector<8x256xf32>
    %178 = arith.mulf %176, %177 : vector<8x256xf32>
    %cst_115 = arith.constant dense<0.000000e+00> : vector<8x256xf32>
    %179 = tpu.matmul %23, %178, %cst_115 {dimension_numbers = #tpu.dot_dimension_numbers<[1], [0], [0], [1], [0, 0, 1, 1], [], []>} : vector<8x8xf32>, vector<8x256xf32>, vector<8x256xf32> -> vector<8x256xf32>
    %180 = arith.addf %175, %179 : vector<8x256xf32>
    %c239_i32_116 = arith.constant 239 : i32
    %181 = tpu.dynamic_rotate %144 by %c239_i32_116 dim 1 : vector<8x256xf32>, i32 -> vector<8x256xf32>
    %182 = vector.broadcast %7 : vector<1x256xf32> to vector<8x256xf32>
    %183 = arith.mulf %181, %182 : vector<8x256xf32>
    %cst_117 = arith.constant dense<0.000000e+00> : vector<8x256xf32>
    %184 = tpu.matmul %25, %183, %cst_117 {dimension_numbers = #tpu.dot_dimension_numbers<[1], [0], [0], [1], [0, 0, 1, 1], [], []>} : vector<8x8xf32>, vector<8x256xf32>, vector<8x256xf32> -> vector<8x256xf32>
    %185 = arith.addf %180, %184 : vector<8x256xf32>
    %186 = vector.broadcast %44 : vector<8x1xf32> to vector<8x256xf32>
    %187 = arith.addf %185, %186 : vector<8x256xf32>
    %cst_118 = arith.constant 0.00999999977 : f32
    %188 = vector.broadcast %cst_118 : f32 to vector<8x256xf32>
    %189 = arith.mulf %188, %187 : vector<8x256xf32>
    %190 = arith.maximumf %187, %189 : vector<8x256xf32>
    %c17_i32_119 = arith.constant 17 : i32
    %191 = tpu.dynamic_rotate %190 by %c17_i32_119 dim 1 : vector<8x256xf32>, i32 -> vector<8x256xf32>
    %192 = vector.broadcast %0 : vector<1x256xf32> to vector<8x256xf32>
    %193 = arith.mulf %191, %192 : vector<8x256xf32>
    %cst_120 = arith.constant dense<0.000000e+00> : vector<8x256xf32>
    %194 = tpu.matmul %27, %193, %cst_120 {dimension_numbers = #tpu.dot_dimension_numbers<[1], [0], [0], [1], [0, 0, 1, 1], [], []>} : vector<8x8xf32>, vector<8x256xf32>, vector<8x256xf32> -> vector<8x256xf32>
    %c16_i32_121 = arith.constant 16 : i32
    %195 = tpu.dynamic_rotate %190 by %c16_i32_121 dim 1 : vector<8x256xf32>, i32 -> vector<8x256xf32>
    %196 = vector.broadcast %1 : vector<1x256xf32> to vector<8x256xf32>
    %197 = arith.mulf %195, %196 : vector<8x256xf32>
    %cst_122 = arith.constant dense<0.000000e+00> : vector<8x256xf32>
    %198 = tpu.matmul %29, %197, %cst_122 {dimension_numbers = #tpu.dot_dimension_numbers<[1], [0], [0], [1], [0, 0, 1, 1], [], []>} : vector<8x8xf32>, vector<8x256xf32>, vector<8x256xf32> -> vector<8x256xf32>
    %199 = arith.addf %194, %198 : vector<8x256xf32>
    %c15_i32_123 = arith.constant 15 : i32
    %200 = tpu.dynamic_rotate %190 by %c15_i32_123 dim 1 : vector<8x256xf32>, i32 -> vector<8x256xf32>
    %201 = vector.broadcast %2 : vector<1x256xf32> to vector<8x256xf32>
    %202 = arith.mulf %200, %201 : vector<8x256xf32>
    %cst_124 = arith.constant dense<0.000000e+00> : vector<8x256xf32>
    %203 = tpu.matmul %31, %202, %cst_124 {dimension_numbers = #tpu.dot_dimension_numbers<[1], [0], [0], [1], [0, 0, 1, 1], [], []>} : vector<8x8xf32>, vector<8x256xf32>, vector<8x256xf32> -> vector<8x256xf32>
    %204 = arith.addf %199, %203 : vector<8x256xf32>
    %c1_i32_125 = arith.constant 1 : i32
    %205 = tpu.dynamic_rotate %190 by %c1_i32_125 dim 1 : vector<8x256xf32>, i32 -> vector<8x256xf32>
    %206 = vector.broadcast %3 : vector<1x256xf32> to vector<8x256xf32>
    %207 = arith.mulf %205, %206 : vector<8x256xf32>
    %cst_126 = arith.constant dense<0.000000e+00> : vector<8x256xf32>
    %208 = tpu.matmul %33, %207, %cst_126 {dimension_numbers = #tpu.dot_dimension_numbers<[1], [0], [0], [1], [0, 0, 1, 1], [], []>} : vector<8x8xf32>, vector<8x256xf32>, vector<8x256xf32> -> vector<8x256xf32>
    %209 = arith.addf %204, %208 : vector<8x256xf32>
    %cst_127 = arith.constant dense<0.000000e+00> : vector<8x256xf32>
    %210 = tpu.matmul %35, %190, %cst_127 {dimension_numbers = #tpu.dot_dimension_numbers<[1], [0], [0], [1], [0, 0, 1, 1], [], []>} : vector<8x8xf32>, vector<8x256xf32>, vector<8x256xf32> -> vector<8x256xf32>
    %211 = arith.addf %209, %210 : vector<8x256xf32>
    %c255_i32_128 = arith.constant 255 : i32
    %212 = tpu.dynamic_rotate %190 by %c255_i32_128 dim 1 : vector<8x256xf32>, i32 -> vector<8x256xf32>
    %213 = vector.broadcast %4 : vector<1x256xf32> to vector<8x256xf32>
    %214 = arith.mulf %212, %213 : vector<8x256xf32>
    %cst_129 = arith.constant dense<0.000000e+00> : vector<8x256xf32>
    %215 = tpu.matmul %37, %214, %cst_129 {dimension_numbers = #tpu.dot_dimension_numbers<[1], [0], [0], [1], [0, 0, 1, 1], [], []>} : vector<8x8xf32>, vector<8x256xf32>, vector<8x256xf32> -> vector<8x256xf32>
    %216 = arith.addf %211, %215 : vector<8x256xf32>
    %c241_i32_130 = arith.constant 241 : i32
    %217 = tpu.dynamic_rotate %190 by %c241_i32_130 dim 1 : vector<8x256xf32>, i32 -> vector<8x256xf32>
    %218 = vector.broadcast %5 : vector<1x256xf32> to vector<8x256xf32>
    %219 = arith.mulf %217, %218 : vector<8x256xf32>
    %cst_131 = arith.constant dense<0.000000e+00> : vector<8x256xf32>
    %220 = tpu.matmul %39, %219, %cst_131 {dimension_numbers = #tpu.dot_dimension_numbers<[1], [0], [0], [1], [0, 0, 1, 1], [], []>} : vector<8x8xf32>, vector<8x256xf32>, vector<8x256xf32> -> vector<8x256xf32>
    %221 = arith.addf %216, %220 : vector<8x256xf32>
    %c240_i32_132 = arith.constant 240 : i32
    %222 = tpu.dynamic_rotate %190 by %c240_i32_132 dim 1 : vector<8x256xf32>, i32 -> vector<8x256xf32>
    %223 = vector.broadcast %6 : vector<1x256xf32> to vector<8x256xf32>
    %224 = arith.mulf %222, %223 : vector<8x256xf32>
    %cst_133 = arith.constant dense<0.000000e+00> : vector<8x256xf32>
    %225 = tpu.matmul %41, %224, %cst_133 {dimension_numbers = #tpu.dot_dimension_numbers<[1], [0], [0], [1], [0, 0, 1, 1], [], []>} : vector<8x8xf32>, vector<8x256xf32>, vector<8x256xf32> -> vector<8x256xf32>
    %226 = arith.addf %221, %225 : vector<8x256xf32>
    %c239_i32_134 = arith.constant 239 : i32
    %227 = tpu.dynamic_rotate %190 by %c239_i32_134 dim 1 : vector<8x256xf32>, i32 -> vector<8x256xf32>
    %228 = vector.broadcast %7 : vector<1x256xf32> to vector<8x256xf32>
    %229 = arith.mulf %227, %228 : vector<8x256xf32>
    %cst_135 = arith.constant dense<0.000000e+00> : vector<8x256xf32>
    %230 = tpu.matmul %43, %229, %cst_135 {dimension_numbers = #tpu.dot_dimension_numbers<[1], [0], [0], [1], [0, 0, 1, 1], [], []>} : vector<8x8xf32>, vector<8x256xf32>, vector<8x256xf32> -> vector<8x256xf32>
    %231 = arith.addf %226, %230 : vector<8x256xf32>
    %232 = vector.broadcast %45 : vector<8x1xf32> to vector<8x256xf32>
    %233 = arith.addf %231, %232 : vector<8x256xf32>
    %cst_136 = arith.constant 0.00999999977 : f32
    %234 = vector.broadcast %cst_136 : f32 to vector<8x256xf32>
    %235 = arith.mulf %234, %233 : vector<8x256xf32>
    %236 = arith.maximumf %233, %235 : vector<8x256xf32>
    %c1_137 = arith.constant 1 : index
    %c0_138 = arith.constant 0 : index
    %c0_139 = arith.constant 0 : index
    %237 = vector.load %arg7[%c1_137, %c0_138, %c0_139] : memref<2x8x256xf32, #tpu.memory_space<vmem>>, vector<1x8x256xf32>
    %238 = vector.shape_cast %237 : vector<1x8x256xf32> to vector<8x256xf32>
    %239 = vector.shape_cast %236 : vector<8x256xf32> to vector<1x8x256xf32>
    tpu.vector_store %arg7[%c1_137, %c0_138, %c0_139], %239 {strides = array<i32>} : memref<2x8x256xf32, #tpu.memory_space<vmem>>, vector<1x8x256xf32>,
    return
  }
  func.func @transform_0(%arg0: i32) -> (i32, i32) {
    %c0_i32 = arith.constant 0 : i32
    %c0_i32_0 = arith.constant 0 : i32
    %c0_i32_1 = arith.constant 0 : i32
    return %c0_i32, %c0_i32_0 : i32, i32
  }
  func.func @transform_1(%arg0: i32) -> (i32, i32, i32) {
    %c0_i32 = arith.constant 0 : i32
    %c0_i32_0 = arith.constant 0 : i32
    %c0_i32_1 = arith.constant 0 : i32
    return %arg0, %c0_i32, %c0_i32_0 : i32, i32, i32
  }
  func.func @transform_2(%arg0: i32) -> (i32, i32, i32) {
    %c0_i32 = arith.constant 0 : i32
    %c0_i32_0 = arith.constant 0 : i32
    %c0_i32_1 = arith.constant 0 : i32
    %c0_i32_2 = arith.constant 0 : i32
    return %c0_i32, %c0_i32_0, %c0_i32_1 : i32, i32, i32
  }
  func.func @transform_3(%arg0: i32) -> (i32, i32, i32) {
    %c0_i32 = arith.constant 0 : i32
    %c0_i32_0 = arith.constant 0 : i32
    %c0_i32_1 = arith.constant 0 : i32
    %c0_i32_2 = arith.constant 0 : i32
    return %c0_i32, %c0_i32_0, %c0_i32_1 : i32, i32, i32
  }
  func.func @transform_4(%arg0: i32) -> (i32, i32) {
    %c0_i32 = arith.constant 0 : i32
    %c0_i32_0 = arith.constant 0 : i32
    %c0_i32_1 = arith.constant 0 : i32
    return %c0_i32, %c0_i32_0 : i32, i32
  }
  func.func @transform_5(%arg0: i32) -> (i32, i32) {
    %c0_i32 = arith.constant 0 : i32
    %c0_i32_0 = arith.constant 0 : i32
    %c0_i32_1 = arith.constant 0 : i32
    return %c0_i32, %c0_i32_0 : i32, i32
  }
  func.func @transform_6(%arg0: i32) -> (i32, i32, i32) {
    %c0_i32 = arith.constant 0 : i32
    %c0_i32_0 = arith.constant 0 : i32
    %c0_i32_1 = arith.constant 0 : i32
    return %arg0, %c0_i32, %c0_i32_0 : i32, i32, i32
  }
}

</mosaic_0001>

<bundles_post_ra>
// kernel: tpu_custom_call.1
= control target key start
LH: loop header
LB: loop body
LE: loop exit
PB: predicated region body
PF: predicated region fallthrough
CT: control target
= control target key end

     0   :  { %s3252_s23 = smov 17   ;;  %s3253_s24 = smov 16   ;;  %v3254_v2 = vmov 0.0   ;;  %s3963_s0 = inlined_call_operand.vmem [shape: f32[8,256], index: 0, kind: input, shape index: {}]   ;;  %s3964_s1 = inlined_call_operand.vmem [shape: f32[2,8,256], index: 1, kind: input, shape index: {}]   ;;  %s3965_s2 = inlined_call_operand.vmem [shape: f32[9,8,8], index: 2, kind: input, shape index: {}]   ;;  %s3966_s3 = inlined_call_operand.vmem [shape: f32[9,8,8], index: 3, kind: input, shape index: {}]   ;;  %s3967_s4 = inlined_call_operand.vmem [shape: f32[8,1], index: 4, kind: input, shape index: {}]   ;;  %s3968_s5 = inlined_call_operand.vmem [shape: f32[8,1], index: 5, kind: input, shape index: {}]   ;;  %s3969_s6 = inlined_call_operand.hbm [shape: f32[2,8,256], index: 6, kind: output, shape index: {}]  }
   0x1   :  { %v3302_v0 = vld [vmem:[%s3964_s1] sm:$0xff]  ;;  %v3311_v1 = vld [vmem:[%s3964_s1 + $0x8] sm:$0xff]  ;;  %187 = vmatprep.mubr.f32.mxu0 %v3254_v2  ;;  %261 = vmatprep.mubr.f32.mxu1 %v3254_v2 }
   0x2   :  { %77 = vrot.lane.b32.xlu1 %v3302_v0, %s3252_s23  ;;  %99 = vrot.lane.b32.xlu0 %v3302_v0, %s3253_s24 }
   0x6   :  { %79 = vrot.lane.b32.xlu1 %v3311_v1, %s3252_s23  ;;  %101 = vrot.lane.b32.xlu0 %v3311_v1, %s3253_s24 }
   0x7   :  { %11 = vsyncpa [#allocation3], 0  ;;  %s3255_s27 = smov 15   ;;  %s3256_s28 = smov 1   ;;  %v3259_v3 = vmov 0   ;;  %v73_v4 = vld [vmem:[%s3967_s4] sm:$0xff]  ;;  %v81_v5 = vlaneseq }
   0x8   :  { %s3257_s29 = smov 127   ;;  %s3258_s30 = smov 113   ;;  %3229 = vset.pattern.permute.xlu0 %v3259_v3  ;;  %v3156_v10 = vld [vmem:[%s3963_s0 + $0x1] ss:$8 sm:$0x3]  ;;  %vm119_vm3 = vcmask 64512  }
   0x9   :  { %s3260_s7 = smov 112   ;;  %s3261_s8 = smov 111   ;;  %v88_v6 = vshrl.u32 %v81_v5, 7  ;;  %v3346_v7 = vand.u32 127, %v81_v5  ;;  %v3400_v32 = vld [vmem:[%s3965_s2 + $0x8] sm:$0xff]  ;;  %v3405_v33 = vld [vmem:[%s3965_s2] sm:$0xff] }
   0xa   :  { %270 = vrot.lane.b32.xlu1 %v3311_v1, %s3255_s27  ;;  %268 = vrot.lane.b32.xlu0 %v3302_v0, %s3255_s27  ;;  %v24_v11 = vld [vmem:[%s3963_s0] ss:$8 sm:$0x3]  ;;  %v3157_v14 = vld [vmem:[%s3963_s0 + $0x2] ss:$8 sm:$0x3] }
   0xb   :  { %v3348_v8 = vsub.s32 0, %v88_v6  ;;  %v3350_v9 = vsub.s32 1, %v88_v6  ;;  %vm83_vm0 = vcmp.lt.s32.totalorder %v3346_v7, 17  ;;  %vm103_vm1 = vcmp.lt.s32.totalorder %v3346_v7, 16  ;;  %v3431_v43 = vld [vmem:[%s3965_s2 + $0x10] sm:$0xff]  ;;  %v3456_v53 = vld [vmem:[%s3965_s2 + $0x18] sm:$0xff] }
   0xc   :  { %vm272_vm2 = vcmp.lt.s32.totalorder %v3346_v7, 15  ;;  %v3158_v31 = vld [vmem:[%s3963_s0 + $0x3] ss:$8 sm:$0x3]  ;;  %vm368_vm4 = vcmp.lt.s32.totalorder %v3346_v7, 1  ;;  %vm540_vm5 = vcmp.lt.s32.totalorder %v3346_v7, 127 }
   0xd   :  { %v3364_v15 = vrot.slane %v3156_v10, %v3350_v9  ;;  %v3367_v16 = vrot.slane %v24_v11, %v3350_v9  ;;  %v3370_v17 = vrot.slane %v3156_v10, %v3348_v8  ;;  %v3373_v18 = vrot.slane %v24_v11, %v3348_v8  ;;  %v3159_v42 = vld [vmem:[%s3963_s0 + $0x4] ss:$8 sm:$0x3]  ;;  %v3160_v52 = vld [vmem:[%s3963_s0 + $0x5] ss:$8 sm:$0x3] }
   0xe   :  { %366 = vrot.lane.b32.xlu1 %v3311_v1, %s3256_s28  ;;  %364 = vrot.lane.b32.xlu0 %v3302_v0, %s3256_s28  ;;  %v3377_v21 = vrot.slane %v3157_v14, %v3348_v8  ;;  %v3380_v22 = vrot.slane %v3157_v14, %v3350_v9  ;;  %v3412_v38 = vrot.slane %v3158_v31, %v3348_v8  ;;  %v3463_v54 = vld [vmem:[%s3965_s2 + $0x20] sm:$0xff]  ;;  %vm636_vm6 = vcmp.lt.s32.totalorder %v3346_v7, 113 }
   0xf   :  { %v3418_v41 = vrot.slane %v3158_v31, %v3350_v9  ;;  %v3439_v48 = vrot.slane %v3159_v42, %v3348_v8  ;;  %v3445_v51 = vrot.slane %v3159_v42, %v3350_v9  ;;  %v3470_v59 = vrot.slane %v3160_v52, %v3348_v8  ;;  %v3161_v63 = vld [vmem:[%s3963_s0 + $0x6] ss:$8 sm:$0x3]  ;;  %v3162_v14 = vld [vmem:[%s3963_s0 + $0x7] ss:$8 sm:$0x3] }
  0x10   :  { %v3476_v62 = vrot.slane %v3160_v52, %v3350_v9  ;;  %vm732_vm7 = vcmp.lt.s32.totalorder %v3346_v7, 112  ;;  %v3500_v11 = vrot.slane %v3161_v63, %v3348_v8  ;;  %vm828_vm8 = vcmp.lt.s32.totalorder %v3346_v7, 111 }
  0x12   :  { %538 = vrot.lane.b32.xlu1 %v3311_v1, %s3257_s29  ;;  %536 = vrot.lane.b32.xlu0 %v3302_v0, %s3257_s29 }
  0x16   :  { %634 = vrot.lane.b32.xlu1 %v3311_v1, %s3258_s30  ;;  %632 = vrot.lane.b32.xlu0 %v3302_v0, %s3258_s30 }
  0x1a   :  { %730 = vrot.lane.b32.xlu1 %v3311_v1, %s3260_s7  ;;  %728 = vrot.lane.b32.xlu0 %v3302_v0, %s3260_s7 }
  0x1e   :  { %826 = vrot.lane.b32.xlu1 %v3311_v1, %s3261_s8  ;;  %824 = vrot.lane.b32.xlu0 %v3302_v0, %s3261_s8 }
  0x22   :  { %922 = vperm.xlu0 %3229, %v73_v4  }
  0x74   :  { %v78_v12 = vpop.permute.xlu1 %77  ;;  %v100_v13 = vpop.permute.xlu0 %99 }
  0x78   :  { %v80_v19 = vpop.permute.xlu1 %79  ;;  %v102_v20 = vpop.permute.xlu0 %101 }
  0x79   :  { %v85_v23 = vsel %vm83_vm0, %v80_v19, %v78_v12  ;;  %v105_v24 = vsel %vm103_vm1, %v102_v20, %v100_v13  ;;  %v104_v25 = vsel %vm103_vm1, %v100_v13, %v102_v20  ;;  %v84_v26 = vsel %vm83_vm0, %v78_v12, %v80_v19  ;;  %v3510_v13 = vld [vmem:[%s3965_s2 + $0x30] sm:$0xff] }
  0x7a   :  { %v118_v27 = vmul.f32 %v3364_v15, %v104_v25  ;;  %v98_v28 = vmul.f32 %v3367_v16, %v84_v26  ;;  %v117_v29 = vmul.f32 %v3370_v17, %v105_v24  ;;  %v97_v30 = vmul.f32 %v3373_v18, %v85_v23 }
  0x7b   :  { %v3503_v12 = vrot.slane %v3161_v63, %v3350_v9 }
  0x7c   :  { %v271_v34 = vpop.permute.xlu1 %270  ;;  %v269_v35 = vpop.permute.xlu0 %268  ;;  %153 = vmatprep.subr.mxu0 %v118_v27  ;;  %227 = vmatprep.subr.mxu1 %v98_v28  ;;  %v3526_v27 = vrot.slane %v3162_v14, %v3348_v8  ;;  %v3529_v28 = vrot.slane %v3162_v14, %v3350_v9 }
  0x7d   :  { %v273_v36 = vsel %vm272_vm2, %v269_v35, %v271_v34  ;;  %v274_v37 = vsel %vm272_vm2, %v271_v34, %v269_v35  ;;  %154 = vmatpush1.msra.mxu0 %v117_v29  ;;  %228 = vmatpush1.msra.mxu1 %v97_v30  ;;  %v3534_v29 = vld [vmem:[%s3965_s2 + $0x38] sm:$0xff] }
  0x7e   :  { %v286_v39 = vmul.f32 %v3377_v21, %v274_v37  ;;  %v287_v40 = vmul.f32 %v3380_v22, %v273_v36  ;;  %3179 = vmatmul.mubr.msk.f32.vlgmr.msra.gmra.mxu0 %vm119_vm3, %v3400_v32  ;;  %3180 = vmatmul.mubr.msk.f32.vlgmr.msra.gmra.mxu1 %vm119_vm3, %v3405_v33  ;;  %v3548_v36 = vld [vmem:[%s3965_s2 + $0x40] sm:$0xff]  ;;  %v3557_v37 = vld [vmem:[%s3964_s1 + $0x18] sm:$0xff] }
  0x7f   :  { %355 = vmatprep.mubr.f32.mxu0 %v3254_v2  ;;  %451 = vmatprep.mubr.f32.mxu1 %v3254_v2 }
  0x80   :  { %v367_v44 = vpop.permute.xlu1 %366  ;;  %v365_v45 = vpop.permute.xlu0 %364  ;;  %321 = vmatprep.subr.mxu0 %v287_v40  ;;  %1701 = vrot.lane.b32.xlu1 %v3557_v37, %s3253_s24 }
  0x81   :  { %v369_v46 = vsel %vm368_vm4, %v365_v45, %v367_v44  ;;  %v370_v47 = vsel %vm368_vm4, %v367_v44, %v365_v45  ;;  %322 = vmatpush1.msra.mxu0 %v286_v39  ;;  %v3562_v39 = vld [vmem:[%s3964_s1 + $0x10] sm:$0xff] }
  0x82   :  { %v382_v49 = vmul.f32 %v3412_v38, %v370_v47  ;;  %v383_v50 = vmul.f32 %v3418_v41, %v369_v46  ;;  %3181 = vmatmul.mubr.msk.f32.vlgmr.msra.gmra.mxu0 %vm119_vm3, %v3431_v43  ;;  %493 = vmatprep.subr.mxu0 %v3311_v1 }
  0x83   :  { %494 = vmatpush1.msra.mxu0 %v3302_v0  ;;  %527 = vmatprep.mubr.f32.mxu0 %v3254_v2  ;;  %v3489_v0 = vld [vmem:[%s3965_s2 + $0x28] sm:$0xff] }
  0x84   :  { %v539_v55 = vpop.permute.xlu1 %538  ;;  %v537_v56 = vpop.permute.xlu0 %536  ;;  %417 = vmatprep.subr.mxu1 %v383_v50  ;;  %1699 = vrot.lane.b32.xlu0 %v3562_v39, %s3253_s24 }
  0x85   :  { %v541_v57 = vsel %vm540_vm5, %v537_v56, %v539_v55  ;;  %v542_v58 = vsel %vm540_vm5, %v539_v55, %v537_v56  ;;  %418 = vmatpush1.msra.mxu1 %v382_v49  ;;  %1693 = vrot.lane.b32.xlu1 %v3557_v37, %s3252_s23 }
  0x86   :  { %v554_v60 = vmul.f32 %v3439_v48, %v541_v57  ;;  %v555_v61 = vmul.f32 %v3445_v51, %v542_v58  ;;  %3182 = vmatmul.mubr.msk.f32.vlgmr.msra.gmra.mxu1 %vm119_vm3, %v3456_v53  ;;  %3183 = vmatmul.mubr.msk.f32.vlgmr.msra.gmra.mxu0 %vm119_vm3, %v3463_v54 }
  0x87   :  { %623 = vmatprep.mubr.f32.mxu1 %v3254_v2  ;;  %719 = vmatprep.mubr.f32.mxu0 %v3254_v2 }
  0x88   :  { %v635_v1 = vpop.permute.xlu1 %634  ;;  %v633_v3 = vpop.permute.xlu0 %632  ;;  %589 = vmatprep.subr.mxu1 %v555_v61  ;;  %1691 = vrot.lane.b32.xlu0 %v3562_v39, %s3252_s23 }
  0x89   :  { %v637_v4 = vsel %vm636_vm6, %v633_v3, %v635_v1  ;;  %v638_v5 = vsel %vm636_vm6, %v635_v1, %v633_v3  ;;  %590 = vmatpush1.msra.mxu1 %v554_v60  ;;  %1851 = vrot.lane.b32.xlu1 %v3557_v37, %s3255_s27 }
  0x8a   :  { %v650_v6 = vmul.f32 %v3470_v59, %v637_v4  ;;  %v651_v10 = vmul.f32 %v3476_v62, %v638_v5  ;;  %3184 = vmatmul.mubr.msk.f32.vlgmr.msra.gmra.mxu1 %vm119_vm3, %v3489_v0 }
  0x8b   :  { %815 = vmatprep.mubr.f32.mxu1 %v3254_v2 }
  0x8c   :  { %v731_v19 = vpop.permute.xlu1 %730  ;;  %v729_v20 = vpop.permute.xlu0 %728  ;;  %685 = vmatprep.subr.mxu0 %v651_v10  ;;  %1849 = vrot.lane.b32.xlu0 %v3562_v39, %s3255_s27 }
  0x8d   :  { %v733_v23 = vsel %vm732_vm7, %v729_v20, %v731_v19  ;;  %v734_v24 = vsel %vm732_vm7, %v731_v19, %v729_v20  ;;  %686 = vmatpush1.msra.mxu0 %v650_v6 }
  0x8e   :  { %v746_v25 = vmul.f32 %v3500_v11, %v733_v23  ;;  %v747_v26 = vmul.f32 %v3503_v12, %v734_v24  ;;  %3185 = vmatmul.mubr.msk.f32.vlgmr.msra.gmra.mxu0 %vm119_vm3, %v3510_v13 }
  0x8f   :  { %911 = vmatprep.mubr.f32.mxu0 %v3254_v2 }
  0x90   :  { %v827_v30 = vpop.permute.xlu1 %826  ;;  %v825_v31 = vpop.permute.xlu0 %824  ;;  %781 = vmatprep.subr.mxu1 %v747_v26 }
  0x91   :  { %v829_v34 = vsel %vm828_vm8, %v825_v31, %v827_v30  ;;  %v830_v8 = vsel %vm828_vm8, %v827_v30, %v825_v31  ;;  %782 = vmatpush1.msra.mxu1 %v746_v25 }
  0x92   :  { %v842_v9 = vmul.f32 %v3526_v27, %v829_v34  ;;  %v843_v35 = vmul.f32 %v3529_v28, %v830_v8  ;;  %3186 = vmatmul.mubr.msk.f32.vlgmr.msra.gmra.mxu1 %vm119_vm3, %v3534_v29 }
  0x93   :  { %1014 = vmatprep.mubr.f32.mxu1 %v3254_v2 }
  0x94   :  { %877 = vmatprep.subr.mxu0 %v843_v35 }
  0x95   :  { %878 = vmatpush1.msra.mxu0 %v842_v9 }
  0x96   :  { %3187 = vmatmul.mubr.msk.f32.vlgmr.msra.gmra.mxu0 %vm119_vm3, %v3548_v36 }
  0x97   :  { %1088 = vmatprep.mubr.f32.mxu0 %v3254_v2 }
  0x9d   :  { %v3576_v31 = vpop.permute.xlu0 %922 }
 0x13e   :  { %v189_v40 = vpop.f32.mrf.mxu0  ;;  %v263_v42 = vpop.f32.mrf.mxu1 }
 0x13f   :  { %v264_v44 = vadd.f32 %v263_v42, %v189_v40 }
 0x140   :  { %v191_v45 = vpop.f32.mrf.mxu0  ;;  %v265_v46 = vpop.f32.mrf.mxu1 }
 0x141   :  { %v266_v47 = vadd.f32 %v265_v46, %v191_v45 }
 0x142   :  { %v357_v49 = vpop.f32.mrf.mxu0 }
 0x143   :  { %v362_v50 = vadd.f32 %v357_v49, %v264_v44  ;;  %v3636_v49 = vpop.permute.xlu1 %1701 }
 0x144   :  { %v359_v52 = vpop.f32.mrf.mxu0 }
 0x145   :  { %v363_v55 = vadd.f32 %v359_v52, %v266_v47 }
 0x146   :  { %v453_v56 = vpop.f32.mrf.mxu1  ;;  %v529_v57 = vpop.f32.mrf.mxu0 }
 0x147   :  { %v458_v58 = vadd.f32 %v453_v56, %v362_v50  ;;  %v3638_v50 = vpop.permute.xlu0 %1699  ;;  %v3640_v52 = vpop.permute.xlu1 %1693 }
 0x148   :  { %v455_v60 = vpop.f32.mrf.mxu1  ;;  %v531_v1 = vpop.f32.mrf.mxu0 }
 0x149   :  { %v459_v61 = vadd.f32 %v455_v60, %v363_v55  ;;  %v534_v63 = vadd.f32 %v529_v57, %v458_v58 }
 0x14a   :  { %v625_v3 = vpop.f32.mrf.mxu1 }
 0x14b   :  { %v535_v4 = vadd.f32 %v531_v1, %v459_v61  ;;  %v630_v5 = vadd.f32 %v625_v3, %v534_v63  ;;  %v3642_v55 = vpop.permute.xlu0 %1691  ;;  %v3644_v56 = vpop.permute.xlu1 %1851 }
 0x14c   :  { %v627_v6 = vpop.f32.mrf.mxu1 }
 0x14d   :  { %v631_v14 = vadd.f32 %v627_v6, %v535_v4  ;;  %v3657_v6 = vld [vmem:[%s3966_s3 + $0x8] sm:$0xff] }
 0x14e   :  { %v721_v10 = vpop.f32.mrf.mxu0 }
 0x14f   :  { %v726_v19 = vadd.f32 %v721_v10, %v630_v5  ;;  %v3646_v57 = vpop.permute.xlu0 %1849 }
 0x150   :  { %v723_v20 = vpop.f32.mrf.mxu0 }
 0x151   :  { %v727_v25 = vadd.f32 %v723_v20, %v631_v14 }
 0x152   :  { %v817_v23 = vpop.f32.mrf.mxu1 }
 0x153   :  { %v822_v26 = vadd.f32 %v817_v23, %v726_v19 }
 0x154   :  { %v819_v24 = vpop.f32.mrf.mxu1 }
 0x155   :  { %v823_v34 = vadd.f32 %v819_v24, %v727_v25  ;;  %v3671_v25 = vld [vmem:[%s3966_s3] sm:$0xff] }
 0x156   :  { %v913_v30 = vpop.f32.mrf.mxu0 }
 0x157   :  { %v918_v8 = vadd.f32 %v913_v30, %v822_v26 }
 0x158   :  { %v915_v9 = vpop.f32.mrf.mxu0 }
 0x159   :  { %v925_v35 = vadd.f32 %v3576_v31, %v918_v8  ;;  %v919_v40 = vadd.f32 %v915_v9, %v823_v34 }
 0x15b   :  { %v927_v42 = vmul.f32 0.01, %v925_v35  ;;  %v926_v44 = vadd.f32 %v3576_v31, %v919_v40  ;;  %v3684_v40 = vld [vmem:[%s3966_s3 + $0x10] sm:$0xff] }
 0x15d   :  { %v3580_v45 = vmax.f32 %v925_v35, %v927_v42  ;;  %v928_v46 = vmul.f32 0.01, %v926_v44 }
 0x15f   :  { %931 = vrot.lane.b32.xlu0 %v3580_v45, %s3252_s23  ;;  %939 = vrot.lane.b32.xlu1 %v3580_v45, %s3253_s24  ;;  %v3586_v47 = vmax.f32 %v926_v44, %v928_v46 }
 0x163   :  { %1095 = vrot.lane.b32.xlu0 %v3580_v45, %s3255_s27  ;;  %941 = vrot.lane.b32.xlu1 %v3586_v47, %s3253_s24 }
 0x167   :  { %1179 = vrot.lane.b32.xlu0 %v3580_v45, %s3256_s28  ;;  %933 = vrot.lane.b32.xlu1 %v3586_v47, %s3252_s23 }
 0x16b   :  { %1339 = vrot.lane.b32.xlu0 %v3580_v45, %s3257_s29  ;;  %1097 = vrot.lane.b32.xlu1 %v3586_v47, %s3255_s27 }
 0x16f   :  { %1423 = vrot.lane.b32.xlu0 %v3580_v45, %s3258_s30  ;;  %1181 = vrot.lane.b32.xlu1 %v3586_v47, %s3256_s28 }
 0x173   :  { %1507 = vrot.lane.b32.xlu0 %v3580_v45, %s3260_s7  ;;  %1341 = vrot.lane.b32.xlu1 %v3586_v47, %s3257_s29 }
 0x177   :  { %1591 = vrot.lane.b32.xlu0 %v3580_v45, %s3261_s8  ;;  %1425 = vrot.lane.b32.xlu1 %v3586_v47, %s3258_s30 }
 0x17b   :  { %1509 = vrot.lane.b32.xlu1 %v3586_v47, %s3260_s7  ;;  %1930 = vrot.lane.b32.xlu0 %v3562_v39, %s3256_s28 }
 0x17f   :  { %1593 = vrot.lane.b32.xlu1 %v3586_v47, %s3261_s8  ;;  %2084 = vrot.lane.b32.xlu0 %v3562_v39, %s3257_s29 }
 0x183   :  { %1932 = vrot.lane.b32.xlu1 %v3557_v37, %s3256_s28  ;;  %2165 = vrot.lane.b32.xlu0 %v3562_v39, %s3258_s30 }
 0x187   :  { %2086 = vrot.lane.b32.xlu1 %v3557_v37, %s3257_s29  ;;  %2246 = vrot.lane.b32.xlu0 %v3562_v39, %s3260_s7 }
 0x18b   :  { %2167 = vrot.lane.b32.xlu1 %v3557_v37, %s3258_s30  ;;  %2327 = vrot.lane.b32.xlu0 %v3562_v39, %s3261_s8 }
 0x18f   :  { %2248 = vrot.lane.b32.xlu1 %v3557_v37, %s3260_s7 }
 0x193   :  { %2329 = vrot.lane.b32.xlu1 %v3557_v37, %s3261_s8 }
 0x1d1   :  { %v932_v58 = vpop.permute.xlu0 %931  ;;  %v940_v60 = vpop.permute.xlu1 %939 }
 0x1d5   :  { %v1096_v61 = vpop.permute.xlu0 %1095  ;;  %v942_v63 = vpop.permute.xlu1 %941 }
 0x1d6   :  { %v943_v1 = vsel %vm103_vm1, %v940_v60, %v942_v63  ;;  %v944_v3 = vsel %vm103_vm1, %v942_v63, %v940_v60  ;;  %v3700_v63 = vld [vmem:[%s3966_s3 + $0x18] sm:$0xff] }
 0x1d7   :  { %v945_v4 = vmul.f32 %v944_v3, %v3370_v17  ;;  %v946_v5 = vmul.f32 %v943_v1, %v3364_v15  ;;  %v3706_v1 = vld [vmem:[%s3966_s3 + $0x20] sm:$0xff] }
 0x1d9   :  { %v1180_v10 = vpop.permute.xlu0 %1179  ;;  %980 = vmatprep.subr.mxu1 %v946_v5  ;;  %v934_v14 = vpop.permute.xlu1 %933 }
 0x1da   :  { %v935_v19 = vsel %vm83_vm0, %v932_v58, %v934_v14  ;;  %v936_v20 = vsel %vm83_vm0, %v934_v14, %v932_v58  ;;  %981 = vmatpush1.msra.mxu1 %v945_v4  ;;  %v3722_v14 = vld [vmem:[%s3966_s3 + $0x28] sm:$0xff] }
 0x1db   :  { %v937_v23 = vmul.f32 %v936_v20, %v3373_v18  ;;  %v938_v24 = vmul.f32 %v935_v19, %v3367_v16  ;;  %3188 = vmatmul.mubr.msk.f32.vlgmr.msra.gmra.mxu1 %vm119_vm3, %v3657_v6 }
 0x1dc   :  { %1170 = vmatprep.mubr.f32.mxu1 %v3254_v2 }
 0x1dd   :  { %v1340_v26 = vpop.permute.xlu0 %1339  ;;  %1054 = vmatprep.subr.mxu0 %v938_v24  ;;  %v1098_v30 = vpop.permute.xlu1 %1097 }
 0x1de   :  { %v1099_v34 = vsel %vm272_vm2, %v1096_v61, %v1098_v30  ;;  %v1100_v8 = vsel %vm272_vm2, %v1098_v30, %v1096_v61  ;;  %1055 = vmatpush1.msra.mxu0 %v937_v23 }
 0x1df   :  { %v1101_v9 = vmul.f32 %v1100_v8, %v3377_v21  ;;  %v1102_v35 = vmul.f32 %v1099_v34, %v3380_v22  ;;  %3189 = vmatmul.mubr.msk.f32.vlgmr.msra.gmra.mxu0 %vm119_vm3, %v3671_v25  ;;  %v3736_v34 = vld [vmem:[%s3966_s3 + $0x30] sm:$0xff] }
 0x1e0   :  { %1254 = vmatprep.mubr.f32.mxu0 %v3254_v2 }
 0x1e1   :  { %v1424_v42 = vpop.permute.xlu0 %1423  ;;  %1136 = vmatprep.subr.mxu1 %v1102_v35  ;;  %v1182_v44 = vpop.permute.xlu1 %1181  ;;  %v1703_v35 = vsel %vm103_vm1, %v3638_v50, %v3636_v49 }
 0x1e2   :  { %v1183_v46 = vsel %vm368_vm4, %v1180_v10, %v1182_v44  ;;  %v1184_v58 = vsel %vm368_vm4, %v1182_v44, %v1180_v10  ;;  %1137 = vmatpush1.msra.mxu1 %v1101_v9 }
 0x1e3   :  { %v1185_v60 = vmul.f32 %v1184_v58, %v3412_v38  ;;  %v1186_v61 = vmul.f32 %v1183_v46, %v3418_v41  ;;  %1296 = vmatprep.subr.mxu1 %v3586_v47  ;;  %3190 = vmatmul.mubr.msk.f32.vlgmr.msra.gmra.mxu1 %vm119_vm3, %v3684_v40 }
 0x1e4   :  { %1297 = vmatpush1.msra.mxu1 %v3580_v45  ;;  %1330 = vmatprep.mubr.f32.mxu1 %v3254_v2 }
 0x1e5   :  { %v1508_v3 = vpop.permute.xlu0 %1507  ;;  %1220 = vmatprep.subr.mxu0 %v1186_v61  ;;  %v1342_v47 = vpop.permute.xlu1 %1341  ;;  %v1853_v61 = vsel %vm272_vm2, %v3646_v57, %v3644_v56 }
 0x1e6   :  { %v1343_v4 = vsel %vm540_vm5, %v1340_v26, %v1342_v47  ;;  %v1344_v45 = vsel %vm540_vm5, %v1342_v47, %v1340_v26  ;;  %1221 = vmatpush1.msra.mxu0 %v1185_v60 }
 0x1e7   :  { %v1345_v5 = vmul.f32 %v1343_v4, %v3439_v48  ;;  %v1346_v10 = vmul.f32 %v1344_v45, %v3445_v51  ;;  %3191 = vmatmul.mubr.msk.f32.vlgmr.msra.gmra.mxu0 %vm119_vm3, %v3700_v63  ;;  %3192 = vmatmul.mubr.msk.f32.vlgmr.msra.gmra.mxu1 %vm119_vm3, %v3706_v1  ;;  %v1695_v45 = vsel %vm83_vm0, %v3642_v55, %v3640_v52 }
 0x1e8   :  { %1414 = vmatprep.mubr.f32.mxu0 %v3254_v2  ;;  %1498 = vmatprep.mubr.f32.mxu1 %v3254_v2 }
 0x1e9   :  { %v1592_v19 = vpop.permute.xlu0 %1591  ;;  %1380 = vmatprep.subr.mxu0 %v1346_v10  ;;  %v1426_v20 = vpop.permute.xlu1 %1425 }
 0x1ea   :  { %v1427_v23 = vsel %vm636_vm6, %v1424_v42, %v1426_v20  ;;  %v1428_v24 = vsel %vm636_vm6, %v1426_v20, %v1424_v42  ;;  %1381 = vmatpush1.msra.mxu0 %v1345_v5  ;;  %v1704_v42 = vsel %vm103_vm1, %v3636_v49, %v3638_v50  ;;  %v3762_v49 = vld [vmem:[%s3966_s3 + $0x38] sm:$0xff]  ;;  %v1854_v5 = vsel %vm272_vm2, %v3644_v56, %v3646_v57  ;;  %v3792_v57 = vld [vmem:[%s3966_s3 + $0x40] sm:$0xff] }
 0x1eb   :  { %v1429_v26 = vmul.f32 %v1427_v23, %v3470_v59  ;;  %v1430_v30 = vmul.f32 %v1428_v24, %v3476_v62  ;;  %3193 = vmatmul.mubr.msk.f32.vlgmr.msra.gmra.mxu0 %vm119_vm3, %v3722_v14  ;;  %v1705_v50 = vmul.f32 %v1704_v42, %v3370_v17  ;;  %v1856_v23 = vmul.f32 %v1853_v61, %v3380_v22 }
 0x1ec   :  { %1582 = vmatprep.mubr.f32.mxu0 %v3254_v2  ;;  %v1696_v56 = vsel %vm83_vm0, %v3640_v52, %v3642_v55 }
 0x1ed   :  { %1464 = vmatprep.subr.mxu1 %v1430_v30  ;;  %v1510_v8 = vpop.permute.xlu1 %1509  ;;  %v1931_v9 = vpop.permute.xlu0 %1930  ;;  %v1698_v30 = vmul.f32 %v1695_v45, %v3367_v16  ;;  %v1697_v52 = vmul.f32 %v1696_v56, %v3373_v18 }
 0x1ee   :  { %v1511_v44 = vsel %vm732_vm7, %v1508_v3, %v1510_v8  ;;  %v1512_v46 = vsel %vm732_vm7, %v1510_v8, %v1508_v3  ;;  %1465 = vmatpush1.msra.mxu1 %v1429_v26  ;;  %v1706_v3 = vmul.f32 %v1703_v35, %v3364_v15  ;;  %v1855_v8 = vmul.f32 %v1854_v5, %v3377_v21 }
 0x1ef   :  { %v1513_v58 = vmul.f32 %v1511_v44, %v3500_v11  ;;  %v1514_v60 = vmul.f32 %v1512_v46, %v3503_v12  ;;  %3194 = vmatmul.mubr.msk.f32.vlgmr.msra.gmra.mxu1 %vm119_vm3, %v3736_v34 }
 0x1f0   :  { %1666 = vmatprep.mubr.f32.mxu1 %v3254_v2 }
 0x1f1   :  { %1548 = vmatprep.subr.mxu0 %v1514_v60  ;;  %v1594_v47 = vpop.permute.xlu1 %1593  ;;  %v2085_v4 = vpop.permute.xlu0 %2084 }
 0x1f2   :  { %v1595_v10 = vsel %vm828_vm8, %v1592_v19, %v1594_v47  ;;  %v1596_v20 = vsel %vm828_vm8, %v1594_v47, %v1592_v19  ;;  %1549 = vmatpush1.msra.mxu0 %v1513_v58 }
 0x1f3   :  { %v1597_v24 = vmul.f32 %v1595_v10, %v3526_v27  ;;  %v1598_v26 = vmul.f32 %v1596_v20, %v3529_v28  ;;  %3195 = vmatmul.mubr.msk.f32.vlgmr.msra.gmra.mxu0 %vm119_vm3, %v3762_v49  ;;  %1737 = vmatprep.subr.mxu0 %v1706_v3 }
 0x1f4   :  { %1738 = vmatpush1.msra.mxu0 %v1705_v50  ;;  %1771 = vmatprep.mubr.f32.mxu0 %v3254_v2 }
 0x1f5   :  { %1632 = vmatprep.subr.mxu1 %v1598_v26  ;;  %1887 = vmatprep.subr.mxu0 %v1856_v23  ;;  %v1933_v19 = vpop.permute.xlu1 %1932  ;;  %v2166_v44 = vpop.permute.xlu0 %2165 }
 0x1f6   :  { %v1934_v35 = vsel %vm368_vm4, %v1931_v9, %v1933_v19  ;;  %1633 = vmatpush1.msra.mxu1 %v1597_v24  ;;  %v1935_v55 = vsel %vm368_vm4, %v1933_v19, %v1931_v9 }
 0x1f7   :  { %v1937_v42 = vmul.f32 %v1934_v35, %v3418_v41  ;;  %3196 = vmatmul.mubr.msk.f32.vlgmr.msra.gmra.mxu1 %vm119_vm3, %v3792_v57  ;;  %3199 = vmatmul.mubr.msk.f32.vlgmr.msra.gmra.mxu0 %vm119_vm3, %v3400_v32  ;;  %v1936_v58 = vmul.f32 %v1935_v55, %v3412_v38 }
 0x1f8   :  { %1808 = vmatprep.subr.mxu1 %v1698_v30  ;;  %1888 = vmatpush1.msra.mxu0 %v1855_v8 }
 0x1f9   :  { %1809 = vmatpush1.msra.mxu1 %v1697_v52  ;;  %v2087_v46 = vpop.permute.xlu1 %2086  ;;  %1842 = vmatprep.mubr.f32.mxu1 %v3254_v2  ;;  %v2247_v50 = vpop.permute.xlu0 %2246 }
 0x1fa   :  { %1968 = vmatprep.subr.mxu1 %v1937_v42  ;;  %v2089_v9 = vsel %vm540_vm5, %v2087_v46, %v2085_v4  ;;  %1921 = vmatprep.mubr.f32.mxu0 %v3254_v2  ;;  %v2088_v60 = vsel %vm540_vm5, %v2085_v4, %v2087_v46 }
 0x1fb   :  { %v2091_v32 = vmul.f32 %v2089_v9, %v3445_v51  ;;  %3200 = vmatmul.mubr.msk.f32.vlgmr.msra.gmra.mxu1 %vm119_vm3, %v3405_v33  ;;  %3201 = vmatmul.mubr.msk.f32.vlgmr.msra.gmra.mxu0 %vm119_vm3, %v3431_v43  ;;  %v2090_v3 = vmul.f32 %v2088_v60, %v3439_v48 }
 0x1fc   :  { %1969 = vmatpush1.msra.mxu1 %v1936_v58  ;;  %2002 = vmatprep.mubr.f32.mxu1 %v3254_v2 }
 0x1fd   :  { %2122 = vmatprep.subr.mxu1 %v2091_v32  ;;  %v2168_v61 = vpop.permute.xlu1 %2167  ;;  %2041 = vmatprep.subr.mxu0 %v3557_v37 }
 0x1fe   :  { %v2169_v47 = vsel %vm636_vm6, %v2166_v44, %v2168_v61  ;;  %v2170_v4 = vsel %vm636_vm6, %v2168_v61, %v2166_v44  ;;  %2042 = vmatpush1.msra.mxu0 %v3562_v39  ;;  %2075 = vmatprep.mubr.f32.mxu0 %v3254_v2 }
 0x1ff   :  { %v2171_v33 = vmul.f32 %v2169_v47, %v3470_v59  ;;  %v2172_v43 = vmul.f32 %v2170_v4, %v3476_v62  ;;  %3202 = vmatmul.mubr.msk.f32.vlgmr.msra.gmra.mxu1 %vm119_vm3, %v3456_v53  ;;  %3203 = vmatmul.mubr.msk.f32.vlgmr.msra.gmra.mxu0 %vm119_vm3, %v3463_v54  ;;  %v2328_v54 = vpop.permute.xlu0 %2327 }
 0x200   :  { %2123 = vmatpush1.msra.mxu1 %v2090_v3  ;;  %2156 = vmatprep.mubr.f32.mxu1 %v3254_v2 }
 0x201   :  { %2203 = vmatprep.subr.mxu0 %v2172_v43  ;;  %v2249_v37 = vpop.permute.xlu1 %2248  ;;  %2237 = vmatprep.mubr.f32.mxu0 %v3254_v2 }
 0x202   :  { %v2250_v39 = vsel %vm732_vm7, %v2247_v50, %v2249_v37  ;;  %v2251_v45 = vsel %vm732_vm7, %v2249_v37, %v2247_v50  ;;  %2204 = vmatpush1.msra.mxu0 %v2171_v33 }
 0x203   :  { %v2252_v5 = vmul.f32 %v2250_v39, %v3500_v11  ;;  %v2253_v53 = vmul.f32 %v2251_v45, %v3503_v12  ;;  %3204 = vmatmul.mubr.msk.f32.vlgmr.msra.gmra.mxu1 %vm119_vm3, %v3489_v0  ;;  %3205 = vmatmul.mubr.msk.f32.vlgmr.msra.gmra.mxu0 %vm119_vm3, %v3510_v13 }
 0x204   :  { %2318 = vmatprep.mubr.f32.mxu1 %v3254_v2  ;;  %2399 = vmatprep.mubr.f32.mxu0 %v3254_v2 }
 0x205   :  { %2284 = vmatprep.subr.mxu1 %v2253_v53  ;;  %v2330_v10 = vpop.permute.xlu1 %2329 }
 0x206   :  { %v2331_v20 = vsel %vm828_vm8, %v2328_v54, %v2330_v10  ;;  %v2332_v23 = vsel %vm828_vm8, %v2330_v10, %v2328_v54  ;;  %2285 = vmatpush1.msra.mxu1 %v2252_v5 }
 0x207   :  { %v2333_v24 = vmul.f32 %v2331_v20, %v3526_v27  ;;  %v2334_v0 = vmul.f32 %v2332_v23, %v3529_v28  ;;  %3206 = vmatmul.mubr.msk.f32.vlgmr.msra.gmra.mxu1 %vm119_vm3, %v3534_v29 }
 0x208   :  { %2494 = vmatprep.mubr.f32.mxu1 %v3254_v2 }
 0x209   :  { %2365 = vmatprep.subr.mxu0 %v2334_v0 }
 0x20a   :  { %2366 = vmatpush1.msra.mxu0 %v2333_v24 }
 0x20b   :  { %3207 = vmatmul.mubr.msk.f32.vlgmr.msra.gmra.mxu0 %vm119_vm3, %v3548_v36 }
 0x20c   :  { %2565 = vmatprep.mubr.f32.mxu0 %v3254_v2 }
 0x29b   :  { %v1016_v13 = vpop.f32.mrf.mxu1 }
 0x29d   :  { %v1018_v26 = vpop.f32.mrf.mxu1 }
 0x29f   :  { %v1090_v56 = vpop.f32.mrf.mxu0 }
 0x2a0   :  { %v1091_v19 = vadd.f32 %v1090_v56, %v1016_v13 }
 0x2a1   :  { %v1092_v30 = vpop.f32.mrf.mxu0 }
 0x2a2   :  { %v1093_v8 = vadd.f32 %v1092_v30, %v1018_v26 }
 0x2a3   :  { %v1172_v35 = vpop.f32.mrf.mxu1 }
 0x2a4   :  { %v1177_v52 = vadd.f32 %v1172_v35, %v1091_v19 }
 0x2a5   :  { %v1174_v55 = vpop.f32.mrf.mxu1 }
 0x2a6   :  { %v1178_v42 = vadd.f32 %v1174_v55, %v1093_v8 }
 0x2a7   :  { %v1256_v29 = vpop.f32.mrf.mxu0  ;;  %v1332_v44 = vpop.f32.mrf.mxu1 }
 0x2a8   :  { %v1261_v46 = vadd.f32 %v1256_v29, %v1177_v52 }
 0x2a9   :  { %v1258_v58 = vpop.f32.mrf.mxu0  ;;  %v1334_v9 = vpop.f32.mrf.mxu1 }
 0x2aa   :  { %v1262_v60 = vadd.f32 %v1258_v58, %v1178_v42  ;;  %v1337_v32 = vadd.f32 %v1332_v44, %v1261_v46 }
 0x2ab   :  { %v1416_v36 = vpop.f32.mrf.mxu0 }
 0x2ac   :  { %v1338_v61 = vadd.f32 %v1334_v9, %v1262_v60  ;;  %v1421_v50 = vadd.f32 %v1416_v36, %v1337_v32 }
 0x2ad   :  { %v1418_v3 = vpop.f32.mrf.mxu0 }
 0x2ae   :  { %v1422_v47 = vadd.f32 %v1418_v3, %v1338_v61 }
 0x2af   :  { %v1500_v4 = vpop.f32.mrf.mxu1 }
 0x2b0   :  { %v1505_v33 = vadd.f32 %v1500_v4, %v1421_v50 }
 0x2b1   :  { %v1502_v43 = vpop.f32.mrf.mxu1 }
 0x2b2   :  { %v1506_v37 = vadd.f32 %v1502_v43, %v1422_v47 }
 0x2b3   :  { %v1584_v39 = vpop.f32.mrf.mxu0 }
 0x2b4   :  { %v1589_v45 = vadd.f32 %v1584_v39, %v1505_v33 }
 0x2b5   :  { %v1586_v5 = vpop.f32.mrf.mxu0 }
 0x2b6   :  { %v1590_v53 = vadd.f32 %v1586_v5, %v1506_v37 }
 0x2b7   :  { %v1668_v54 = vpop.f32.mrf.mxu1  ;;  %v1773_v10 = vpop.f32.mrf.mxu0 }
 0x2b8   :  { %v3859_v20 = vadd.f32 %v1668_v54, %v1589_v45 }
 0x2b9   :  { %v1670_v23 = vpop.f32.mrf.mxu1  ;;  %v1775_v24 = vpop.f32.mrf.mxu0 }
 0x2ba   :  { %v3861_v0 = vadd.f32 %v1670_v23, %v1590_v53 }
 0x2bb   :  { %v1844_v13 = vpop.f32.mrf.mxu1  ;;  %v1923_v26 = vpop.f32.mrf.mxu0 }
 0x2bc   :  { %v1845_v56 = vadd.f32 %v1844_v13, %v1773_v10 }
 0x2bd   :  { %v1846_v19 = vpop.f32.mrf.mxu1  ;;  %v1925_v30 = vpop.f32.mrf.mxu0 }
 0x2be   :  { %v1847_v8 = vadd.f32 %v1846_v19, %v1775_v24  ;;  %v1928_v35 = vadd.f32 %v1923_v26, %v1845_v56 }
 0x2bf   :  { %v2004_v52 = vpop.f32.mrf.mxu1  ;;  %v2077_v55 = vpop.f32.mrf.mxu0 }
 0x2c0   :  { %v1929_v42 = vadd.f32 %v1925_v30, %v1847_v8  ;;  %v2009_v29 = vadd.f32 %v2004_v52, %v1928_v35 }
 0x2c1   :  { %v2006_v44 = vpop.f32.mrf.mxu1  ;;  %v2079_v46 = vpop.f32.mrf.mxu0 }
 0x2c2   :  { %v2010_v58 = vadd.f32 %v2006_v44, %v1929_v42  ;;  %v2082_v9 = vadd.f32 %v2077_v55, %v2009_v29 }
 0x2c3   :  { %v2158_v60 = vpop.f32.mrf.mxu1  ;;  %v2239_v32 = vpop.f32.mrf.mxu0 }
 0x2c4   :  { %v2083_v36 = vadd.f32 %v2079_v46, %v2010_v58  ;;  %v2163_v61 = vadd.f32 %v2158_v60, %v2082_v9 }
 0x2c5   :  { %v2160_v50 = vpop.f32.mrf.mxu1  ;;  %v2241_v3 = vpop.f32.mrf.mxu0 }
 0x2c6   :  { %v2164_v47 = vadd.f32 %v2160_v50, %v2083_v36  ;;  %v2244_v4 = vadd.f32 %v2239_v32, %v2163_v61 }
 0x2c7   :  { %v2320_v33 = vpop.f32.mrf.mxu1 }
 0x2c8   :  { %v2245_v43 = vadd.f32 %v2241_v3, %v2164_v47  ;;  %v2325_v39 = vadd.f32 %v2320_v33, %v2244_v4 }
 0x2c9   :  { %v2322_v37 = vpop.f32.mrf.mxu1 }
 0x2ca   :  { %v2326_v5 = vadd.f32 %v2322_v37, %v2245_v43 }
 0x2cb   :  { %v2401_v45 = vpop.f32.mrf.mxu0 }
 0x2cc   :  { %v2406_v53 = vadd.f32 %v2401_v45, %v2325_v39 }
 0x2cd   :  { %v2403_v54 = vpop.f32.mrf.mxu0 }
 0x2ce   :  { %v2408_v10 = vadd.f32 %v2406_v53, %v3576_v31  ;;  %v2407_v23 = vadd.f32 %v2403_v54, %v2326_v5 }
 0x2d0   :  { %v2410_v24 = vmul.f32 0.01, %v2408_v10  ;;  %v2409_v13 = vadd.f32 %v2407_v23, %v3576_v31  ;;  %v74_v31 = vld [vmem:[%s3968_s5] sm:$0xff]  ;;  %s3262_s5 = smov [#allocation2]  }
 0x2d2   :  { %v2412_v26 = vmax.f32 %v2408_v10, %v2410_v24  ;;  %v2411_v56 = vmul.f32 0.01, %v2409_v13 }
 0x2d4   :  { %v2413_v19 = vmax.f32 %v2409_v13, %v2411_v56  ;;  %2422 = vrot.lane.b32.xlu0 %v2412_v26, %s3253_s24 }
 0x2d6   :  { %2424 = vrot.lane.b32.xlu1 %v2413_v19, %s3253_s24 }
 0x2d8   :  { %2414 = vrot.lane.b32.xlu0 %v2412_v26, %s3252_s23 }
 0x2da   :  { %2416 = vrot.lane.b32.xlu1 %v2413_v19, %s3252_s23 }
 0x2dc   :  { %2572 = vrot.lane.b32.xlu0 %v2412_v26, %s3255_s27 }
 0x2de   :  { %2574 = vrot.lane.b32.xlu1 %v2413_v19, %s3255_s27  ;;  %s3145_s27 = sshll.u32 %s3262_s5, 4  ;;  %s3146_s27 = int_to_ptr.vmem [resolvable:$true] %s3145_s27 }
 0x2df   :  { %p3235_p1 = scmp.lt.s32.totalorder %s3146_s27, %s3146_s27 }
 0x2e0   :  { %2653 = vrot.lane.b32.xlu0 %v2412_v26, %s3256_s28 }
 0x2e2   :  { %2655 = vrot.lane.b32.xlu1 %v2413_v19, %s3256_s28  ;;  %s3230_s28 = scalar_lea.vmem %s3146_s27, 512 }
 0x2e3   :  { %p3231_p0 = scmp.ne.s32.totalorder %s3146_s27, %s3230_s28  ;;  %p3236_p2 = scmp.lt.s32.totalorder %s3230_s28, %s3230_s28 }
 0x2e4   :  { %2807 = vrot.lane.b32.xlu0 %v2412_v26, %s3257_s29 }
 0x2e5   :  { %p3237_p3 = por %p3236_p2, %p3235_p1 }
 0x2e6   :  { %2809 = vrot.lane.b32.xlu1 %v2413_v19, %s3257_s29 }
 0x2e7   :  { %p3238_p4 = pnand %p3237_p3, %p3231_p0 }
 0x2e8   :  { %2888 = vrot.lane.b32.xlu0 %v2412_v26, %s3258_s30 }
 0x2ea   :  { %2890 = vrot.lane.b32.xlu1 %v2413_v19, %s3258_s30 }
 0x2ec   :  { %2969 = vrot.lane.b32.xlu0 %v2412_v26, %s3260_s7 }
 0x2ee   :  { %2971 = vrot.lane.b32.xlu1 %v2413_v19, %s3260_s7 }
 0x2f0   :  { %3050 = vrot.lane.b32.xlu0 %v2412_v26, %s3261_s8 }
 0x2f2   :  { %3052 = vrot.lane.b32.xlu1 %v2413_v19, %s3261_s8 }
 0x2f4   :  { %1677 = vperm.xlu0 %3229, %v74_v31  }
 0x346   :  { %v2423_v30 = vpop.permute.xlu0 %2422 }
 0x348   :  { %v2425_v8 = vpop.permute.xlu1 %2424 }
 0x349   :  { %v2426_v35 = vsel %vm103_vm1, %v2423_v30, %v2425_v8  ;;  %v2427_v52 = vsel %vm103_vm1, %v2425_v8, %v2423_v30 }
 0x34a   :  { %v2428_v55 = vmul.f32 %v2427_v52, %v3370_v17  ;;  %v2429_v42 = vmul.f32 %v2426_v35, %v3364_v15  ;;  %v2415_v29 = vpop.permute.xlu0 %2414 }
 0x34c   :  { %2460 = vmatprep.subr.mxu1 %v2429_v42  ;;  %v2417_v44 = vpop.permute.xlu1 %2416 }
 0x34d   :  { %v2418_v46 = vsel %vm83_vm0, %v2415_v29, %v2417_v44  ;;  %v2419_v58 = vsel %vm83_vm0, %v2417_v44, %v2415_v29  ;;  %2461 = vmatpush1.msra.mxu1 %v2428_v55 }
 0x34e   :  { %v2420_v9 = vmul.f32 %v2419_v58, %v3373_v18  ;;  %v2421_v60 = vmul.f32 %v2418_v46, %v3367_v16  ;;  %v2573_v32 = vpop.permute.xlu0 %2572  ;;  %3208 = vmatmul.mubr.msk.f32.vlgmr.msra.gmra.mxu1 %vm119_vm3, %v3657_v6 }
 0x34f   :  { %2644 = vmatprep.mubr.f32.mxu1 %v3254_v2 }
 0x350   :  { %2531 = vmatprep.subr.mxu0 %v2421_v60  ;;  %v2575_v15 = vpop.permute.xlu1 %2574 }
 0x351   :  { %v2576_v17 = vsel %vm272_vm2, %v2573_v32, %v2575_v15  ;;  %v2577_v36 = vsel %vm272_vm2, %v2575_v15, %v2573_v32  ;;  %2532 = vmatpush1.msra.mxu0 %v2420_v9 }
 0x352   :  { %v2578_v61 = vmul.f32 %v2577_v36, %v3377_v21  ;;  %v2579_v18 = vmul.f32 %v2576_v17, %v3380_v22  ;;  %v2654_v16 = vpop.permute.xlu0 %2653  ;;  %3209 = vmatmul.mubr.msk.f32.vlgmr.msra.gmra.mxu0 %vm119_vm3, %v3671_v25 }
 0x353   :  { %2725 = vmatprep.mubr.f32.mxu0 %v3254_v2 }
 0x354   :  { %2610 = vmatprep.subr.mxu1 %v2579_v18  ;;  %v2656_v6 = vpop.permute.xlu1 %2655 }
 0x355   :  { %v2657_v50 = vsel %vm368_vm4, %v2654_v16, %v2656_v6  ;;  %v2658_v3 = vsel %vm368_vm4, %v2656_v6, %v2654_v16  ;;  %2611 = vmatpush1.msra.mxu1 %v2578_v61 }
 0x356   :  { %v2659_v47 = vmul.f32 %v2658_v3, %v3412_v38  ;;  %v2660_v21 = vmul.f32 %v2657_v50, %v3418_v41  ;;  %v2808_v22 = vpop.permute.xlu0 %2807  ;;  %2764 = vmatprep.subr.mxu1 %v2413_v19  ;;  %3210 = vmatmul.mubr.msk.f32.vlgmr.msra.gmra.mxu1 %vm119_vm3, %v3684_v40 }
 0x357   :  { %2765 = vmatpush1.msra.mxu1 %v2412_v26  ;;  %2798 = vmatprep.mubr.f32.mxu1 %v3254_v2 }
 0x358   :  { %2691 = vmatprep.subr.mxu0 %v2660_v21  ;;  %v2810_v25 = vpop.permute.xlu1 %2809 }
 0x359   :  { %v2811_v4 = vsel %vm540_vm5, %v2808_v22, %v2810_v25  ;;  %v2812_v33 = vsel %vm540_vm5, %v2810_v25, %v2808_v22  ;;  %2692 = vmatpush1.msra.mxu0 %v2659_v47 }
 0x35a   :  { %v2813_v38 = vmul.f32 %v2811_v4, %v3439_v48  ;;  %v2814_v41 = vmul.f32 %v2812_v33, %v3445_v51  ;;  %v2889_v43 = vpop.permute.xlu0 %2888  ;;  %3211 = vmatmul.mubr.msk.f32.vlgmr.msra.gmra.mxu0 %vm119_vm3, %v3700_v63  ;;  %3212 = vmatmul.mubr.msk.f32.vlgmr.msra.gmra.mxu1 %vm119_vm3, %v3706_v1 }
 0x35b   :  { %2879 = vmatprep.mubr.f32.mxu0 %v3254_v2  ;;  %2960 = vmatprep.mubr.f32.mxu1 %v3254_v2 }
 0x35c   :  { %2845 = vmatprep.subr.mxu0 %v2814_v41  ;;  %v2891_v40 = vpop.permute.xlu1 %2890 }
 0x35d   :  { %v2892_v37 = vsel %vm636_vm6, %v2889_v43, %v2891_v40  ;;  %v2893_v48 = vsel %vm636_vm6, %v2891_v40, %v2889_v43  ;;  %2846 = vmatpush1.msra.mxu0 %v2813_v38 }
 0x35e   :  { %v2894_v51 = vmul.f32 %v2892_v37, %v3470_v59  ;;  %v2895_v63 = vmul.f32 %v2893_v48, %v3476_v62  ;;  %v2970_v39 = vpop.permute.xlu0 %2969  ;;  %3213 = vmatmul.mubr.msk.f32.vlgmr.msra.gmra.mxu0 %vm119_vm3, %v3722_v14 }
 0x35f   :  { %3041 = vmatprep.mubr.f32.mxu0 %v3254_v2 }
 0x360   :  { %2926 = vmatprep.subr.mxu1 %v2895_v63  ;;  %v2972_v1 = vpop.permute.xlu1 %2971 }
 0x361   :  { %v2973_v45 = vsel %vm732_vm7, %v2970_v39, %v2972_v1  ;;  %v2974_v5 = vsel %vm732_vm7, %v2972_v1, %v2970_v39  ;;  %2927 = vmatpush1.msra.mxu1 %v2894_v51 }
 0x362   :  { %v2975_v53 = vmul.f32 %v2973_v45, %v3500_v11  ;;  %v2976_v59 = vmul.f32 %v2974_v5, %v3503_v12  ;;  %3214 = vmatmul.mubr.msk.f32.vlgmr.msra.gmra.mxu1 %vm119_vm3, %v3736_v34  ;;  %v3051_v62 = vpop.permute.xlu0 %3050 }
 0x363   :  { %3122 = vmatprep.mubr.f32.mxu1 %v3254_v2 }
 0x364   :  { %3007 = vmatprep.subr.mxu0 %v2976_v59  ;;  %v3053_v14 = vpop.permute.xlu1 %3052 }
 0x365   :  { %v3054_v54 = vsel %vm828_vm8, %v3051_v62, %v3053_v14  ;;  %v3055_v10 = vsel %vm828_vm8, %v3053_v14, %v3051_v62  ;;  %3008 = vmatpush1.msra.mxu0 %v2975_v53 }
 0x366   :  { %v3056_v23 = vmul.f32 %v3054_v54, %v3526_v27  ;;  %v3057_v11 = vmul.f32 %v3055_v10, %v3529_v28  ;;  %3215 = vmatmul.mubr.msk.f32.vlgmr.msra.gmra.mxu0 %vm119_vm3, %v3762_v49 }
 0x368   :  { %3088 = vmatprep.subr.mxu1 %v3057_v11 }
 0x369   :  { %3089 = vmatpush1.msra.mxu1 %v3056_v23 }
 0x36a   :  { %3216 = vmatmul.mubr.msk.f32.vlgmr.msra.gmra.mxu1 %vm119_vm3, %v3792_v57 }
 0x36f   :  { %v1678_v2 = vpop.permute.xlu0 %1677 }
 0x370   :  { %v1680_v12 = vadd.f32 %v1678_v2, %v3859_v20  ;;  %v1681_v34 = vadd.f32 %v1678_v2, %v3861_v0 }
 0x372   :  { %v1682_v7 = vmul.f32 0.01, %v1680_v12  ;;  %v1683_v24 = vmul.f32 0.01, %v1681_v34 }
 0x374   :  { %v1684_v13 = vmax.f32 %v1680_v12, %v1682_v7  ;;  %v1685_v26 = vmax.f32 %v1681_v34, %v1683_v24 }
 0x376   :  { %1686 = vst [vmem:[#allocation2] sm:$0xff] %v1684_v13  ;;  %1687 = vst [vmem:[#allocation2 + $0x8] sm:$0xff] %v1685_v26 }
 0x40e   :  { %v2496_v27 = vpop.f32.mrf.mxu1 }
 0x410   :  { %v2498_v28 = vpop.f32.mrf.mxu1 }
 0x412   :  { %v2567_v56 = vpop.f32.mrf.mxu0 }
 0x413   :  { %v2568_v49 = vadd.f32 %v2567_v56, %v2496_v27 }
 0x414   :  { %v2569_v19 = vpop.f32.mrf.mxu0 }
 0x415   :  { %v2570_v31 = vadd.f32 %v2569_v19, %v2498_v28 }
 0x416   :  { %v2646_v30 = vpop.f32.mrf.mxu1 }
 0x417   :  { %v2651_v8 = vadd.f32 %v2646_v30, %v2568_v49 }
 0x418   :  { %v2648_v57 = vpop.f32.mrf.mxu1 }
 0x419   :  { %v2652_v35 = vadd.f32 %v2648_v57, %v2570_v31 }
 0x41a   :  { %v2727_v52 = vpop.f32.mrf.mxu0  ;;  %v2800_v20 = vpop.f32.mrf.mxu1 }
 0x41b   :  { %v2732_v55 = vadd.f32 %v2727_v52, %v2651_v8 }
 0x41c   :  { %v2729_v0 = vpop.f32.mrf.mxu0  ;;  %v2802_v44 = vpop.f32.mrf.mxu1 }
 0x41d   :  { %v2733_v42 = vadd.f32 %v2729_v0, %v2652_v35  ;;  %v2805_v29 = vadd.f32 %v2800_v20, %v2732_v55 }
 0x41e   :  { %v2881_v46 = vpop.f32.mrf.mxu0 }
 0x41f   :  { %v2806_v58 = vadd.f32 %v2802_v44, %v2733_v42  ;;  %v2886_v9 = vadd.f32 %v2881_v46, %v2805_v29 }
 0x420   :  { %v2883_v60 = vpop.f32.mrf.mxu0 }
 0x421   :  { %v2887_v15 = vadd.f32 %v2883_v60, %v2806_v58 }
 0x422   :  { %v2962_v32 = vpop.f32.mrf.mxu1 }
 0x423   :  { %v2967_v17 = vadd.f32 %v2962_v32, %v2886_v9 }
 0x424   :  { %v2964_v36 = vpop.f32.mrf.mxu1 }
 0x425   :  { %v2968_v16 = vadd.f32 %v2964_v36, %v2887_v15 }
 0x426   :  { %v3043_v61 = vpop.f32.mrf.mxu0 }
 0x427   :  { %v3048_v6 = vadd.f32 %v3043_v61, %v2967_v17 }
 0x428   :  { %v3045_v18 = vpop.f32.mrf.mxu0 }
 0x429   :  { %v3049_v3 = vadd.f32 %v3045_v18, %v2968_v16 }
 0x42a   :  { %v3124_v50 = vpop.f32.mrf.mxu1 }
 0x42b   :  { %v3129_v47 = vadd.f32 %v3124_v50, %v3048_v6 }
 0x42c   :  { %v3126_v21 = vpop.f32.mrf.mxu1 }
 0x42d   :  { %v3131_v22 = vadd.f32 %v3129_v47, %v1678_v2  ;;  %v3130_v25 = vadd.f32 %v3126_v21, %v3049_v3 }
 0x42f   :  { %v3133_v4 = vmul.f32 0.01, %v3131_v22  ;;  %v3132_v33 = vadd.f32 %v3130_v25, %v1678_v2 }
 0x431   :  { %v3135_v38 = vmax.f32 %v3131_v22, %v3133_v4  ;;  %v3134_v41 = vmul.f32 0.01, %v3132_v33 }
 0x433   :  { %3138 = vst [vmem:[#allocation2 + $0x10] sm:$0xff] %v3135_v38  ;;  %v3136_v43 = vmax.f32 %v3132_v33, %v3134_v41 }
 0x435   :  { %3139 = vst [vmem:[#allocation2 + $0x18] sm:$0xff] %v3136_v43 }
 0x436   :  { %3241 = shalt.err (!%p3238_p4)
}
 0x437   :  { %s3263_s29 = smov 256  }
 0x438   :  { %3151 = dma.vmem_to_hbm [thread:$0]  %s3146_s27, 512, %s3969_s6, [#allocation3], %s3263_s29, %s3263_s29, %s3253_s24  }
 0x439   :  { %3250 = dma.done.wait [#allocation3], 512  }
 0x43a   :  { %3251 = vsyncadd [#allocation3], 4294966784 }
 0x43b   :  { %3155 = vsyncpa [#allocation3], 1 }

</bundles_post_ra>
